<compile_context>
chip_gen: v6e
topology: v6e:2x2x1
jax: 0.10.0
libtpu: 0.0.40
codegen_flags: <defaults>
</compile_context>

<pallas_src>
import functools

import jax
import jax.numpy as jnp
from jax import lax
from jax.experimental import pallas as pl
from jax.experimental.pallas import tpu as pltpu

# ---- model config (small, consistent with the module's __init__) ----
EMB_DIM = 32
N_HEADS = 4
HEAD_DIM = EMB_DIM // N_HEADS
CONTEXT_LEN = 8
FF_DIM = 4 * EMB_DIM
EPS = 1e-5

_GELU_C = 0.7978845608028654  # sqrt(2/pi), hoisted constant


def _layernorm(x, gamma, beta):
    # matches torch: mean / biased var over last dim; rsqrt goes to the EUP
    mean = jnp.mean(x, axis=-1, keepdims=True)
    var = jnp.mean((x - mean) ** 2, axis=-1, keepdims=True)
    return gamma * ((x - mean) * lax.rsqrt(var + EPS)) + beta


def _gelu_tanh(x):
    # 0.5 * x * (1 + tanh(sqrt(2/pi) * (x + 0.044715 * x^3)))
    x2 = x * x
    x3 = x2 * x
    return 0.5 * x * (1.0 + jnp.tanh(_GELU_C * (x + 0.044715 * x3)))


def _transformer_block_kernel(
    x_ref,        # (bb, T, E)
    wqkv_ref,     # (3*nh, E, hd)  rows: [q_h0..q_h{nh-1} | k_h0.. | v_h0..]
    wo_ref,       # (nh, hd, E)    per-head slices of the output projection
    w1_ref,       # (E, F)
    w2_ref,       # (F, E)
    vec_ref,      # (8, F) packed rows: [bo, g1, s1, g2, s2, b1, b2, 0]
    out_ref,      # (bb, T, E)
    *, num_heads, head_dim, seq_len, emb_dim,
):
    bb = x_ref.shape[0]
    rows = bb * seq_len

    # Packed bias/scale slab: one (8,128) VMEM tile, sliced from lane 0.
    vec = vec_ref[...]
    bo = vec[0, :emb_dim]
    g1 = vec[1, :emb_dim]
    s1 = vec[2, :emb_dim]
    g2 = vec[3, :emb_dim]
    s2 = vec[4, :emb_dim]
    b1 = vec[5, :]
    b2 = vec[6, :emb_dim]

    # Flatten the batch block into rows: only merges leading dims (T=8 aligns
    # with the sublane tile), so this is a layout no-op.
    x = x_ref[...].astype(jnp.float32).reshape(rows, emb_dim)   # (rows, E)

    # -------- LN1 --------
    xn = _layernorm(x, g1, s1)

    # causal mask bias (T, T); large finite negative instead of -inf
    row_ids = lax.broadcasted_iota(jnp.int32, (seq_len, seq_len), 0)
    col_ids = lax.broadcasted_iota(jnp.int32, (seq_len, seq_len), 1)
    mask_bias = jnp.where(col_ids > row_ids, jnp.float32(-1e30), jnp.float32(0.0))

    inv_sqrt_d = jnp.float32(1.0 / (head_dim ** 0.5))

    # -------- multi-head causal attention --------
    # Per-head weights are indexed on the leading dim, so every matmul result
    # starts at lane 0 (no lane-offset-8/16/24 or 32/64 slices anywhere).
    attn_out = jnp.zeros((rows, emb_dim), jnp.float32)
    for h in range(num_heads):                       # static unroll over heads
        qh = jnp.dot(xn, wqkv_ref[h], preferred_element_type=jnp.float32)
        kh = jnp.dot(xn, wqkv_ref[num_heads + h], preferred_element_type=jnp.float32)
        vh = jnp.dot(xn, wqkv_ref[2 * num_heads + h], preferred_element_type=jnp.float32)
        qh = qh.reshape(bb, seq_len, head_dim)       # leading-dim split only
        kh = kh.reshape(bb, seq_len, head_dim)
        vh = vh.reshape(bb, seq_len, head_dim)

        # scores: contract head_dim, batch over bb -> (bb, T, T); no explicit .T
        s = lax.dot_general(qh, kh, (((2,), (2,)), ((0,), (0,))),
                            preferred_element_type=jnp.float32)
        s = s * inv_sqrt_d + mask_bias
        s = s - jnp.max(s, axis=-1, keepdims=True)
        e = jnp.exp(s)
        denom = jnp.sum(e, axis=-1, keepdims=True)
        # EUP reciprocal + VPU multiply instead of a VALU divide.
        w = e * pl.reciprocal(denom, approx=True)

        # context: (bb, T, T) x (bb, T, hd) -> (bb, T, hd)
        ctx_h = lax.dot_general(w, vh, (((2,), (1,)), ((0,), (0,))),
                                preferred_element_type=jnp.float32)

        # fold the per-head slice of the output projection; no concat needed
        attn_out = attn_out + jnp.dot(
            ctx_h.reshape(rows, head_dim), wo_ref[h],
            preferred_element_type=jnp.float32,
        )

    attn_out = attn_out + bo

    # residual 1  (dropout is identity)
    x1 = x + attn_out

    # -------- LN2 + feed-forward --------
    x2n = _layernorm(x1, g2, s2)
    h1 = jnp.dot(x2n, w1_ref[...], preferred_element_type=jnp.float32) + b1
    h1 = _gelu_tanh(h1)
    ff_out = jnp.dot(h1, w2_ref[...], preferred_element_type=jnp.float32) + b2

    y = x1 + ff_out
    out_ref[...] = y.reshape(bb, seq_len, emb_dim).astype(out_ref.dtype)


def _default_batch_block(B, T, E, F):
    """Pick batch_block: single grid step for small problems; split only when
    each block still gets >= 256 rows (v7x megacore) and fits a VMEM budget."""
    row_bytes = (9 * E + 2 * F) * 4          # rough f32 intermediate footprint/row
    vmem_budget = 8 << 20                    # well inside scoped VMEM on all chips
    max_rows = max(T, vmem_budget // row_bytes)
    min_rows_per_block = 256                 # amortize step overhead / fill MXU M

    # Largest divisor of B whose block fits the VMEM budget (grid as small as possible).
    bb = 1
    for cand in range(1, B + 1):
        if B % cand == 0 and cand * T <= max_rows:
            bb = cand

    # Optional 2-way parallel split (megacore) only when each half is still big.
    if bb == B and B % 2 == 0 and (B // 2) * T >= min_rows_per_block:
        bb = B // 2
    return bb


def transformer_block(x, params, *, batch_block=None):
    """x: (B, T, E) float32; params: dict of pre-transposed weights."""
    B, T, E = x.shape
    F = params["w1"].shape[1]
    nh, hd = N_HEADS, HEAD_DIM

    if batch_block is None:
        batch_block = _default_batch_block(B, T, E, F)
    assert B % batch_block == 0, "batch_block must divide B"
    num_blocks = B // batch_block

    # ---- wrapper-side weight repacking (trace-time, free) ----
    # per-head QKV weights stacked on the leading dim: (3*nh, E, hd)
    def split_heads(w):                      # (E, E) -> (nh, E, hd)
        return jnp.transpose(w.reshape(E, nh, hd), (1, 0, 2))
    wqkv_h = jnp.concatenate(
        [split_heads(params["wq"]), split_heads(params["wk"]), split_heads(params["wv"])],
        axis=0)                              # (3*nh, E, hd)
    # per-head output projection rows: (nh, hd, E)
    wo_h = params["wo"].reshape(nh, hd, E)

    # pack the seven bias/scale vectors into one (8, F) slab
    def pad_row(v):                          # (1, k) -> (F,)
        return jnp.pad(v[0], (0, F - v.shape[1]))
    vec = jnp.stack([
        pad_row(params["bo"]),
        pad_row(params["ln1_scale"]), pad_row(params["ln1_shift"]),
        pad_row(params["ln2_scale"]), pad_row(params["ln2_shift"]),
        params["b1"][0],
        pad_row(params["b2"]),
        jnp.zeros((F,), jnp.float32),
    ], axis=0)                               # (8, F)

    kernel = functools.partial(
        _transformer_block_kernel,
        num_heads=nh, head_dim=hd, seq_len=T, emb_dim=E,
    )

    full = lambda shape: pl.BlockSpec(shape, lambda b: (0,) * len(shape))

    return pl.pallas_call(
        kernel,
        out_shape=jax.ShapeDtypeStruct((B, T, E), jnp.float32),
        grid=(num_blocks,),
        in_specs=[
            pl.BlockSpec((batch_block, T, E), lambda b: (b, 0, 0)),  # x
            full((3 * nh, E, hd)),   # stacked per-head QKV weights
            full((nh, hd, E)),       # per-head output projection
            full((E, F)),            # ff w1
            full((F, E)),            # ff w2
            full((8, F)),            # packed biases / LN scale+shift
        ],
        out_specs=pl.BlockSpec((batch_block, T, E), lambda b: (b, 0, 0)),
        compiler_params=pltpu.CompilerParams(
            dimension_semantics=("parallel",),
        ),
    )(x, wqkv_h, wo_h, params["w1"], params["w2"], vec)


def init_params(key):
    """Deterministic synthetic params. Weights stored already transposed (in_dim, out_dim)."""
    ks = jax.random.split(key, 10)
    s = 0.02
    return {
        # qkv_bias=False -> no q/k/v biases
        "wq": s * jax.random.normal(ks[0], (EMB_DIM, EMB_DIM), jnp.float32),
        "wk": s * jax.random.normal(ks[1], (EMB_DIM, EMB_DIM), jnp.float32),
        "wv": s * jax.random.normal(ks[2], (EMB_DIM, EMB_DIM), jnp.float32),
        "wo": s * jax.random.normal(ks[3], (EMB_DIM, EMB_DIM), jnp.float32),
        "bo": s * jax.random.normal(ks[4], (1, EMB_DIM), jnp.float32),
        "ln1_scale": jnp.ones((1, EMB_DIM), jnp.float32),
        "ln1_shift": jnp.zeros((1, EMB_DIM), jnp.float32),
        "ln2_scale": jnp.ones((1, EMB_DIM), jnp.float32),
        "ln2_shift": jnp.zeros((1, EMB_DIM), jnp.float32),
        "w1": s * jax.random.normal(ks[5], (EMB_DIM, FF_DIM), jnp.float32),
        "b1": s * jax.random.normal(ks[6], (1, FF_DIM), jnp.float32),
        "w2": s * jax.random.normal(ks[7], (FF_DIM, EMB_DIM), jnp.float32),
        "b2": s * jax.random.normal(ks[8], (1, EMB_DIM), jnp.float32),
    }


def _reference(x, p):
    """Pure-JAX reference mirroring the PyTorch forward (for a sanity check)."""
    def ln(v, g, b):
        m = v.mean(-1, keepdims=True)
        var = ((v - m) ** 2).mean(-1, keepdims=True)
        return g * (v - m) / jnp.sqrt(var + EPS) + b

    B, T, E = x.shape
    xn = ln(x, p["ln1_scale"][0], p["ln1_shift"][0])
    q = xn @ p["wq"]; k = xn @ p["wk"]; v = xn @ p["wv"]
    q = q.reshape(B, T, N_HEADS, HEAD_DIM).transpose(0, 2, 1, 3)
    k = k.reshape(B, T, N_HEADS, HEAD_DIM).transpose(0, 2, 1, 3)
    v = v.reshape(B, T, N_HEADS, HEAD_DIM).transpose(0, 2, 1, 3)
    scores = jnp.einsum("bhqd,bhkd->bhqk", q, k) / jnp.sqrt(jnp.float32(HEAD_DIM))
    mask = jnp.triu(jnp.ones((T, T), bool), k=1)
    scores = jnp.where(mask, -jnp.inf, scores)
    w = jax.nn.softmax(scores, axis=-1)
    ctx = jnp.einsum("bhqk,bhkd->bhqd", w, v).transpose(0, 2, 1, 3).reshape(B, T, E)
    attn = ctx @ p["wo"] + p["bo"][0]
    x1 = x + attn
    x2n = ln(x1, p["ln2_scale"][0], p["ln2_shift"][0])
    h = x2n @ p["w1"] + p["b1"][0]
    h = 0.5 * h * (1 + jnp.tanh(jnp.sqrt(2.0 / jnp.pi) * (h + 0.044715 * h ** 3)))
    return x1 + (h @ p["w2"] + p["b2"][0])


if __name__ == "__main__":
    key = jax.random.PRNGKey(0)
    k_x, k_p = jax.random.split(key)

    B, T = 2, CONTEXT_LEN  # batch=2, seq=8, emb=32
    x = jax.random.normal(k_x, (B, T, EMB_DIM), jnp.float32)
    params = init_params(k_p)

    out = transformer_block(x, params)   # default path: grid=(1,) for this size
    out = jax.block_until_ready(out)

    ref = _reference(x, params)
    assert out.shape == (B, T, EMB_DIM)
    assert jnp.allclose(out, ref, atol=1e-4, rtol=1e-4), "mismatch vs JAX reference"

    print("KERNEL_OK")
</pallas_src>

<mosaic_0001>
module attributes {stable_mosaic.version = 11 : i64} {
  func.func @_transformer_block_kernel(%arg0: i32, %arg1: memref<2x8x32xf32, #tpu.memory_space<vmem>>, %arg2: memref<12x32x8xf32, #tpu.memory_space<vmem>>, %arg3: memref<4x8x32xf32, #tpu.memory_space<vmem>>, %arg4: memref<32x128xf32, #tpu.memory_space<vmem>>, %arg5: memref<128x32xf32, #tpu.memory_space<vmem>>, %arg6: memref<8x128xf32, #tpu.memory_space<vmem>>, %arg7: memref<2x8x32xf32, #tpu.memory_space<vmem>>) attributes {dimension_semantics = [#tpu.dimension_semantics<parallel>], iteration_bounds = array<i64: 1>, scalar_prefetch = 0 : i64, scratch_operands = 0 : i64, tpu.core_type = #tpu.core_type<tc>, window_params = [{transform_indices = @transform_0, window_bounds = array<i64: 2, 8, 32>}, {pipeline_mode = #tpu.pipeline_mode<synchronous>, transform_indices = @transform_1, window_bounds = array<i64: 12, 32, 8>}, {pipeline_mode = #tpu.pipeline_mode<synchronous>, transform_indices = @transform_2, window_bounds = array<i64: 4, 8, 32>}, {pipeline_mode = #tpu.pipeline_mode<synchronous>, transform_indices = @transform_3, window_bounds = array<i64: 32, 128>}, {pipeline_mode = #tpu.pipeline_mode<synchronous>, transform_indices = @transform_4, window_bounds = array<i64: 128, 32>}, {pipeline_mode = #tpu.pipeline_mode<synchronous>, transform_indices = @transform_5, window_bounds = array<i64: 8, 128>}, {transform_indices = @transform_6, window_bounds = array<i64: 2, 8, 32>}]} {
    %c0 = arith.constant 0 : index
    %c0_0 = arith.constant 0 : index
    %0 = vector.load %arg6[%c0, %c0_0] : memref<8x128xf32, #tpu.memory_space<vmem>>, vector<8x128xf32>
    %1 = vector.extract_strided_slice %0 {offsets = [0, 0], sizes = [1, 32], strides = [1, 1]} : vector<8x128xf32> to vector<1x32xf32>
    %2 = vector.shape_cast %1 : vector<1x32xf32> to vector<32xf32>
    %3 = vector.extract_strided_slice %0 {offsets = [1, 0], sizes = [1, 32], strides = [1, 1]} : vector<8x128xf32> to vector<1x32xf32>
    %4 = vector.shape_cast %3 : vector<1x32xf32> to vector<32xf32>
    %5 = vector.extract_strided_slice %0 {offsets = [2, 0], sizes = [1, 32], strides = [1, 1]} : vector<8x128xf32> to vector<1x32xf32>
    %6 = vector.shape_cast %5 : vector<1x32xf32> to vector<32xf32>
    %7 = vector.extract_strided_slice %0 {offsets = [3, 0], sizes = [1, 32], strides = [1, 1]} : vector<8x128xf32> to vector<1x32xf32>
    %8 = vector.shape_cast %7 : vector<1x32xf32> to vector<32xf32>
    %9 = vector.extract_strided_slice %0 {offsets = [4, 0], sizes = [1, 32], strides = [1, 1]} : vector<8x128xf32> to vector<1x32xf32>
    %10 = vector.shape_cast %9 : vector<1x32xf32> to vector<32xf32>
    %11 = vector.extract_strided_slice %0 {offsets = [5, 0], sizes = [1, 128], strides = [1, 1]} : vector<8x128xf32> to vector<1x128xf32>
    %12 = vector.shape_cast %11 : vector<1x128xf32> to vector<128xf32>
    %13 = vector.extract_strided_slice %0 {offsets = [6, 0], sizes = [1, 32], strides = [1, 1]} : vector<8x128xf32> to vector<1x32xf32>
    %14 = vector.shape_cast %13 : vector<1x32xf32> to vector<32xf32>
    %c0_1 = arith.constant 0 : index
    %c0_2 = arith.constant 0 : index
    %c0_3 = arith.constant 0 : index
    %15 = vector.load %arg1[%c0_1, %c0_2, %c0_3] : memref<2x8x32xf32, #tpu.memory_space<vmem>>, vector<2x8x32xf32>
    %16 = vector.shape_cast %15 : vector<2x8x32xf32> to vector<16x32xf32>
    %cst = arith.constant dense<0.000000e+00> : vector<16xf32>
    %17 = vector.multi_reduction <add>, %16, %cst [1] : vector<16x32xf32> to vector<16xf32>
    %18 = vector.shape_cast %17 : vector<16xf32> to vector<16x1xf32>
    %cst_4 = arith.constant 3.200000e+01 : f32
    %19 = vector.broadcast %cst_4 : f32 to vector<16x1xf32>
    %20 = arith.divf %18, %19 : vector<16x1xf32>
    %21 = vector.broadcast %20 : vector<16x1xf32> to vector<16x32xf32>
    %22 = arith.subf %16, %21 : vector<16x32xf32>
    %23 = arith.mulf %22, %22 : vector<16x32xf32>
    %cst_5 = arith.constant dense<0.000000e+00> : vector<16xf32>
    %24 = vector.multi_reduction <add>, %23, %cst_5 [1] : vector<16x32xf32> to vector<16xf32>
    %25 = vector.shape_cast %24 : vector<16xf32> to vector<16x1xf32>
    %cst_6 = arith.constant 3.200000e+01 : f32
    %26 = vector.broadcast %cst_6 : f32 to vector<16x1xf32>
    %27 = arith.divf %25, %26 : vector<16x1xf32>
    %28 = vector.broadcast %20 : vector<16x1xf32> to vector<16x32xf32>
    %29 = arith.subf %16, %28 : vector<16x32xf32>
    %cst_7 = arith.constant 9.99999974E-6 : f32
    %30 = vector.broadcast %cst_7 : f32 to vector<16x1xf32>
    %31 = arith.addf %27, %30 : vector<16x1xf32>
    %32 = math.rsqrt %31 : vector<16x1xf32>
    %33 = vector.broadcast %32 : vector<16x1xf32> to vector<16x32xf32>
    %34 = arith.mulf %29, %33 : vector<16x32xf32>
    %35 = vector.shape_cast %4 : vector<32xf32> to vector<1x32xf32>
    %36 = vector.broadcast %35 : vector<1x32xf32> to vector<16x32xf32>
    %37 = arith.mulf %36, %34 : vector<16x32xf32>
    %38 = vector.shape_cast %6 : vector<32xf32> to vector<1x32xf32>
    %39 = vector.broadcast %38 : vector<1x32xf32> to vector<16x32xf32>
    %40 = arith.addf %37, %39 : vector<16x32xf32>
    %41 = tpu.iota {dimensions = array<i32: 0>} : vector<8x8xi32>
    %42 = tpu.iota {dimensions = array<i32: 1>} : vector<8x8xi32>
    %43 = arith.cmpi sgt, %42, %41 : vector<8x8xi32>
    %cst_8 = arith.constant -1.000000e+30 : f32
    %cst_9 = arith.constant 0.000000e+00 : f32
    %44 = vector.broadcast %cst_8 : f32 to vector<8x8xf32>
    %45 = vector.broadcast %cst_9 : f32 to vector<8x8xf32>
    %46 = arith.select %43, %44, %45 : vector<8x8xi1>, vector<8x8xf32>
    %cst_10 = arith.constant 0.000000e+00 : f32
    %47 = vector.broadcast %cst_10 : f32 to vector<16x32xf32>
    %c0_11 = arith.constant 0 : index
    %c0_12 = arith.constant 0 : index
    %c0_13 = arith.constant 0 : index
    %48 = vector.load %arg2[%c0_11, %c0_12, %c0_13] : memref<12x32x8xf32, #tpu.memory_space<vmem>>, vector<1x32x8xf32>
    %49 = vector.shape_cast %48 : vector<1x32x8xf32> to vector<32x8xf32>
    %cst_14 = arith.constant dense<0.000000e+00> : vector<16x8xf32>
    %50 = tpu.matmul %40, %49, %cst_14 {dimension_numbers = #tpu.dot_dimension_numbers<[1], [0], [0], [1], [0, 0, 1, 1], [], []>} : vector<16x32xf32>, vector<32x8xf32>, vector<16x8xf32> -> vector<16x8xf32>
    %c4 = arith.constant 4 : index
    %c0_15 = arith.constant 0 : index
    %c0_16 = arith.constant 0 : index
    %51 = vector.load %arg2[%c4, %c0_15, %c0_16] : memref<12x32x8xf32, #tpu.memory_space<vmem>>, vector<1x32x8xf32>
    %52 = vector.shape_cast %51 : vector<1x32x8xf32> to vector<32x8xf32>
    %cst_17 = arith.constant dense<0.000000e+00> : vector<16x8xf32>
    %53 = tpu.matmul %40, %52, %cst_17 {dimension_numbers = #tpu.dot_dimension_numbers<[1], [0], [0], [1], [0, 0, 1, 1], [], []>} : vector<16x32xf32>, vector<32x8xf32>, vector<16x8xf32> -> vector<16x8xf32>
    %c8 = arith.constant 8 : index
    %c0_18 = arith.constant 0 : index
    %c0_19 = arith.constant 0 : index
    %54 = vector.load %arg2[%c8, %c0_18, %c0_19] : memref<12x32x8xf32, #tpu.memory_space<vmem>>, vector<1x32x8xf32>
    %55 = vector.shape_cast %54 : vector<1x32x8xf32> to vector<32x8xf32>
    %cst_20 = arith.constant dense<0.000000e+00> : vector<16x8xf32>
    %56 = tpu.matmul %40, %55, %cst_20 {dimension_numbers = #tpu.dot_dimension_numbers<[1], [0], [0], [1], [0, 0, 1, 1], [], []>} : vector<16x32xf32>, vector<32x8xf32>, vector<16x8xf32> -> vector<16x8xf32>
    %57 = vector.shape_cast %50 : vector<16x8xf32> to vector<2x8x8xf32>
    %58 = vector.shape_cast %53 : vector<16x8xf32> to vector<2x8x8xf32>
    %59 = vector.shape_cast %56 : vector<16x8xf32> to vector<2x8x8xf32>
    %cst_21 = arith.constant dense<0.000000e+00> : vector<2x8x8xf32>
    %60 = tpu.matmul %57, %58, %cst_21 {dimension_numbers = #tpu.dot_dimension_numbers<[2], [2], [1], [1], [0, 0, 0, 1, 1, 1], [0], [0]>} : vector<2x8x8xf32>, vector<2x8x8xf32>, vector<2x8x8xf32> -> vector<2x8x8xf32>
    %cst_22 = arith.constant 0.353553385 : f32
    %61 = vector.broadcast %cst_22 : f32 to vector<2x8x8xf32>
    %62 = arith.mulf %60, %61 : vector<2x8x8xf32>
    %63 = vector.shape_cast %46 : vector<8x8xf32> to vector<1x8x8xf32>
    %64 = vector.broadcast %63 : vector<1x8x8xf32> to vector<2x8x8xf32>
    %65 = arith.addf %62, %64 : vector<2x8x8xf32>
    %cst_23 = arith.constant dense<0xFF800000> : vector<2x8xf32>
    %66 = vector.multi_reduction <maximumf>, %65, %cst_23 [2] : vector<2x8x8xf32> to vector<2x8xf32>
    %67 = vector.shape_cast %66 : vector<2x8xf32> to vector<2x8x1xf32>
    %68 = vector.broadcast %67 : vector<2x8x1xf32> to vector<2x8x8xf32>
    %69 = arith.subf %65, %68 : vector<2x8x8xf32>
    %70 = math.exp %69 : vector<2x8x8xf32>
    %cst_24 = arith.constant dense<0.000000e+00> : vector<2x8xf32>
    %71 = vector.multi_reduction <add>, %70, %cst_24 [2] : vector<2x8x8xf32> to vector<2x8xf32>
    %72 = vector.shape_cast %71 : vector<2x8xf32> to vector<2x8x1xf32>
    %73 = tpu.reciprocal %72 {approx = true} : vector<2x8x1xf32> -> vector<2x8x1xf32>
    %74 = vector.broadcast %73 : vector<2x8x1xf32> to vector<2x8x8xf32>
    %75 = arith.mulf %70, %74 : vector<2x8x8xf32>
    %cst_25 = arith.constant dense<0.000000e+00> : vector<2x8x8xf32>
    %76 = tpu.matmul %75, %59, %cst_25 {dimension_numbers = #tpu.dot_dimension_numbers<[2], [1], [1], [2], [0, 0, 0, 1, 1, 2], [0], [0]>} : vector<2x8x8xf32>, vector<2x8x8xf32>, vector<2x8x8xf32> -> vector<2x8x8xf32>
    %77 = vector.shape_cast %76 : vector<2x8x8xf32> to vector<16x8xf32>
    %c0_26 = arith.constant 0 : index
    %c0_27 = arith.constant 0 : index
    %c0_28 = arith.constant 0 : index
    %78 = vector.load %arg3[%c0_26, %c0_27, %c0_28] : memref<4x8x32xf32, #tpu.memory_space<vmem>>, vector<1x8x32xf32>
    %79 = vector.shape_cast %78 : vector<1x8x32xf32> to vector<8x32xf32>
    %cst_29 = arith.constant dense<0.000000e+00> : vector<16x32xf32>
    %80 = tpu.matmul %77, %79, %cst_29 {dimension_numbers = #tpu.dot_dimension_numbers<[1], [0], [0], [1], [0, 0, 1, 1], [], []>} : vector<16x8xf32>, vector<8x32xf32>, vector<16x32xf32> -> vector<16x32xf32>
    %81 = arith.addf %47, %80 : vector<16x32xf32>
    %c1 = arith.constant 1 : index
    %c0_30 = arith.constant 0 : index
    %c0_31 = arith.constant 0 : index
    %82 = vector.load %arg2[%c1, %c0_30, %c0_31] : memref<12x32x8xf32, #tpu.memory_space<vmem>>, vector<1x32x8xf32>
    %83 = vector.shape_cast %82 : vector<1x32x8xf32> to vector<32x8xf32>
    %cst_32 = arith.constant dense<0.000000e+00> : vector<16x8xf32>
    %84 = tpu.matmul %40, %83, %cst_32 {dimension_numbers = #tpu.dot_dimension_numbers<[1], [0], [0], [1], [0, 0, 1, 1], [], []>} : vector<16x32xf32>, vector<32x8xf32>, vector<16x8xf32> -> vector<16x8xf32>
    %c5 = arith.constant 5 : index
    %c0_33 = arith.constant 0 : index
    %c0_34 = arith.constant 0 : index
    %85 = vector.load %arg2[%c5, %c0_33, %c0_34] : memref<12x32x8xf32, #tpu.memory_space<vmem>>, vector<1x32x8xf32>
    %86 = vector.shape_cast %85 : vector<1x32x8xf32> to vector<32x8xf32>
    %cst_35 = arith.constant dense<0.000000e+00> : vector<16x8xf32>
    %87 = tpu.matmul %40, %86, %cst_35 {dimension_numbers = #tpu.dot_dimension_numbers<[1], [0], [0], [1], [0, 0, 1, 1], [], []>} : vector<16x32xf32>, vector<32x8xf32>, vector<16x8xf32> -> vector<16x8xf32>
    %c9 = arith.constant 9 : index
    %c0_36 = arith.constant 0 : index
    %c0_37 = arith.constant 0 : index
    %88 = vector.load %arg2[%c9, %c0_36, %c0_37] : memref<12x32x8xf32, #tpu.memory_space<vmem>>, vector<1x32x8xf32>
    %89 = vector.shape_cast %88 : vector<1x32x8xf32> to vector<32x8xf32>
    %cst_38 = arith.constant dense<0.000000e+00> : vector<16x8xf32>
    %90 = tpu.matmul %40, %89, %cst_38 {dimension_numbers = #tpu.dot_dimension_numbers<[1], [0], [0], [1], [0, 0, 1, 1], [], []>} : vector<16x32xf32>, vector<32x8xf32>, vector<16x8xf32> -> vector<16x8xf32>
    %91 = vector.shape_cast %84 : vector<16x8xf32> to vector<2x8x8xf32>
    %92 = vector.shape_cast %87 : vector<16x8xf32> to vector<2x8x8xf32>
    %93 = vector.shape_cast %90 : vector<16x8xf32> to vector<2x8x8xf32>
    %cst_39 = arith.constant dense<0.000000e+00> : vector<2x8x8xf32>
    %94 = tpu.matmul %91, %92, %cst_39 {dimension_numbers = #tpu.dot_dimension_numbers<[2], [2], [1], [1], [0, 0, 0, 1, 1, 1], [0], [0]>} : vector<2x8x8xf32>, vector<2x8x8xf32>, vector<2x8x8xf32> -> vector<2x8x8xf32>
    %cst_40 = arith.constant 0.353553385 : f32
    %95 = vector.broadcast %cst_40 : f32 to vector<2x8x8xf32>
    %96 = arith.mulf %94, %95 : vector<2x8x8xf32>
    %97 = vector.shape_cast %46 : vector<8x8xf32> to vector<1x8x8xf32>
    %98 = vector.broadcast %97 : vector<1x8x8xf32> to vector<2x8x8xf32>
    %99 = arith.addf %96, %98 : vector<2x8x8xf32>
    %cst_41 = arith.constant dense<0xFF800000> : vector<2x8xf32>
    %100 = vector.multi_reduction <maximumf>, %99, %cst_41 [2] : vector<2x8x8xf32> to vector<2x8xf32>
    %101 = vector.shape_cast %100 : vector<2x8xf32> to vector<2x8x1xf32>
    %102 = vector.broadcast %101 : vector<2x8x1xf32> to vector<2x8x8xf32>
    %103 = arith.subf %99, %102 : vector<2x8x8xf32>
    %104 = math.exp %103 : vector<2x8x8xf32>
    %cst_42 = arith.constant dense<0.000000e+00> : vector<2x8xf32>
    %105 = vector.multi_reduction <add>, %104, %cst_42 [2] : vector<2x8x8xf32> to vector<2x8xf32>
    %106 = vector.shape_cast %105 : vector<2x8xf32> to vector<2x8x1xf32>
    %107 = tpu.reciprocal %106 {approx = true} : vector<2x8x1xf32> -> vector<2x8x1xf32>
    %108 = vector.broadcast %107 : vector<2x8x1xf32> to vector<2x8x8xf32>
    %109 = arith.mulf %104, %108 : vector<2x8x8xf32>
    %cst_43 = arith.constant dense<0.000000e+00> : vector<2x8x8xf32>
    %110 = tpu.matmul %109, %93, %cst_43 {dimension_numbers = #tpu.dot_dimension_numbers<[2], [1], [1], [2], [0, 0, 0, 1, 1, 2], [0], [0]>} : vector<2x8x8xf32>, vector<2x8x8xf32>, vector<2x8x8xf32> -> vector<2x8x8xf32>
    %111 = vector.shape_cast %110 : vector<2x8x8xf32> to vector<16x8xf32>
    %c1_44 = arith.constant 1 : index
    %c0_45 = arith.constant 0 : index
    %c0_46 = arith.constant 0 : index
    %112 = vector.load %arg3[%c1_44, %c0_45, %c0_46] : memref<4x8x32xf32, #tpu.memory_space<vmem>>, vector<1x8x32xf32>
    %113 = vector.shape_cast %112 : vector<1x8x32xf32> to vector<8x32xf32>
    %cst_47 = arith.constant dense<0.000000e+00> : vector<16x32xf32>
    %114 = tpu.matmul %111, %113, %cst_47 {dimension_numbers = #tpu.dot_dimension_numbers<[1], [0], [0], [1], [0, 0, 1, 1], [], []>} : vector<16x8xf32>, vector<8x32xf32>, vector<16x32xf32> -> vector<16x32xf32>
    %115 = arith.addf %81, %114 : vector<16x32xf32>
    %c2 = arith.constant 2 : index
    %c0_48 = arith.constant 0 : index
    %c0_49 = arith.constant 0 : index
    %116 = vector.load %arg2[%c2, %c0_48, %c0_49] : memref<12x32x8xf32, #tpu.memory_space<vmem>>, vector<1x32x8xf32>
    %117 = vector.shape_cast %116 : vector<1x32x8xf32> to vector<32x8xf32>
    %cst_50 = arith.constant dense<0.000000e+00> : vector<16x8xf32>
    %118 = tpu.matmul %40, %117, %cst_50 {dimension_numbers = #tpu.dot_dimension_numbers<[1], [0], [0], [1], [0, 0, 1, 1], [], []>} : vector<16x32xf32>, vector<32x8xf32>, vector<16x8xf32> -> vector<16x8xf32>
    %c6 = arith.constant 6 : index
    %c0_51 = arith.constant 0 : index
    %c0_52 = arith.constant 0 : index
    %119 = vector.load %arg2[%c6, %c0_51, %c0_52] : memref<12x32x8xf32, #tpu.memory_space<vmem>>, vector<1x32x8xf32>
    %120 = vector.shape_cast %119 : vector<1x32x8xf32> to vector<32x8xf32>
    %cst_53 = arith.constant dense<0.000000e+00> : vector<16x8xf32>
    %121 = tpu.matmul %40, %120, %cst_53 {dimension_numbers = #tpu.dot_dimension_numbers<[1], [0], [0], [1], [0, 0, 1, 1], [], []>} : vector<16x32xf32>, vector<32x8xf32>, vector<16x8xf32> -> vector<16x8xf32>
    %c10 = arith.constant 10 : index
    %c0_54 = arith.constant 0 : index
    %c0_55 = arith.constant 0 : index
    %122 = vector.load %arg2[%c10, %c0_54, %c0_55] : memref<12x32x8xf32, #tpu.memory_space<vmem>>, vector<1x32x8xf32>
    %123 = vector.shape_cast %122 : vector<1x32x8xf32> to vector<32x8xf32>
    %cst_56 = arith.constant dense<0.000000e+00> : vector<16x8xf32>
    %124 = tpu.matmul %40, %123, %cst_56 {dimension_numbers = #tpu.dot_dimension_numbers<[1], [0], [0], [1], [0, 0, 1, 1], [], []>} : vector<16x32xf32>, vector<32x8xf32>, vector<16x8xf32> -> vector<16x8xf32>
    %125 = vector.shape_cast %118 : vector<16x8xf32> to vector<2x8x8xf32>
    %126 = vector.shape_cast %121 : vector<16x8xf32> to vector<2x8x8xf32>
    %127 = vector.shape_cast %124 : vector<16x8xf32> to vector<2x8x8xf32>
    %cst_57 = arith.constant dense<0.000000e+00> : vector<2x8x8xf32>
    %128 = tpu.matmul %125, %126, %cst_57 {dimension_numbers = #tpu.dot_dimension_numbers<[2], [2], [1], [1], [0, 0, 0, 1, 1, 1], [0], [0]>} : vector<2x8x8xf32>, vector<2x8x8xf32>, vector<2x8x8xf32> -> vector<2x8x8xf32>
    %cst_58 = arith.constant 0.353553385 : f32
    %129 = vector.broadcast %cst_58 : f32 to vector<2x8x8xf32>
    %130 = arith.mulf %128, %129 : vector<2x8x8xf32>
    %131 = vector.shape_cast %46 : vector<8x8xf32> to vector<1x8x8xf32>
    %132 = vector.broadcast %131 : vector<1x8x8xf32> to vector<2x8x8xf32>
    %133 = arith.addf %130, %132 : vector<2x8x8xf32>
    %cst_59 = arith.constant dense<0xFF800000> : vector<2x8xf32>
    %134 = vector.multi_reduction <maximumf>, %133, %cst_59 [2] : vector<2x8x8xf32> to vector<2x8xf32>
    %135 = vector.shape_cast %134 : vector<2x8xf32> to vector<2x8x1xf32>
    %136 = vector.broadcast %135 : vector<2x8x1xf32> to vector<2x8x8xf32>
    %137 = arith.subf %133, %136 : vector<2x8x8xf32>
    %138 = math.exp %137 : vector<2x8x8xf32>
    %cst_60 = arith.constant dense<0.000000e+00> : vector<2x8xf32>
    %139 = vector.multi_reduction <add>, %138, %cst_60 [2] : vector<2x8x8xf32> to vector<2x8xf32>
    %140 = vector.shape_cast %139 : vector<2x8xf32> to vector<2x8x1xf32>
    %141 = tpu.reciprocal %140 {approx = true} : vector<2x8x1xf32> -> vector<2x8x1xf32>
    %142 = vector.broadcast %141 : vector<2x8x1xf32> to vector<2x8x8xf32>
    %143 = arith.mulf %138, %142 : vector<2x8x8xf32>
    %cst_61 = arith.constant dense<0.000000e+00> : vector<2x8x8xf32>
    %144 = tpu.matmul %143, %127, %cst_61 {dimension_numbers = #tpu.dot_dimension_numbers<[2], [1], [1], [2], [0, 0, 0, 1, 1, 2], [0], [0]>} : vector<2x8x8xf32>, vector<2x8x8xf32>, vector<2x8x8xf32> -> vector<2x8x8xf32>
    %145 = vector.shape_cast %144 : vector<2x8x8xf32> to vector<16x8xf32>
    %c2_62 = arith.constant 2 : index
    %c0_63 = arith.constant 0 : index
    %c0_64 = arith.constant 0 : index
    %146 = vector.load %arg3[%c2_62, %c0_63, %c0_64] : memref<4x8x32xf32, #tpu.memory_space<vmem>>, vector<1x8x32xf32>
    %147 = vector.shape_cast %146 : vector<1x8x32xf32> to vector<8x32xf32>
    %cst_65 = arith.constant dense<0.000000e+00> : vector<16x32xf32>
    %148 = tpu.matmul %145, %147, %cst_65 {dimension_numbers = #tpu.dot_dimension_numbers<[1], [0], [0], [1], [0, 0, 1, 1], [], []>} : vector<16x8xf32>, vector<8x32xf32>, vector<16x32xf32> -> vector<16x32xf32>
    %149 = arith.addf %115, %148 : vector<16x32xf32>
    %c3 = arith.constant 3 : index
    %c0_66 = arith.constant 0 : index
    %c0_67 = arith.constant 0 : index
    %150 = vector.load %arg2[%c3, %c0_66, %c0_67] : memref<12x32x8xf32, #tpu.memory_space<vmem>>, vector<1x32x8xf32>
    %151 = vector.shape_cast %150 : vector<1x32x8xf32> to vector<32x8xf32>
    %cst_68 = arith.constant dense<0.000000e+00> : vector<16x8xf32>
    %152 = tpu.matmul %40, %151, %cst_68 {dimension_numbers = #tpu.dot_dimension_numbers<[1], [0], [0], [1], [0, 0, 1, 1], [], []>} : vector<16x32xf32>, vector<32x8xf32>, vector<16x8xf32> -> vector<16x8xf32>
    %c7 = arith.constant 7 : index
    %c0_69 = arith.constant 0 : index
    %c0_70 = arith.constant 0 : index
    %153 = vector.load %arg2[%c7, %c0_69, %c0_70] : memref<12x32x8xf32, #tpu.memory_space<vmem>>, vector<1x32x8xf32>
    %154 = vector.shape_cast %153 : vector<1x32x8xf32> to vector<32x8xf32>
    %cst_71 = arith.constant dense<0.000000e+00> : vector<16x8xf32>
    %155 = tpu.matmul %40, %154, %cst_71 {dimension_numbers = #tpu.dot_dimension_numbers<[1], [0], [0], [1], [0, 0, 1, 1], [], []>} : vector<16x32xf32>, vector<32x8xf32>, vector<16x8xf32> -> vector<16x8xf32>
    %c11 = arith.constant 11 : index
    %c0_72 = arith.constant 0 : index
    %c0_73 = arith.constant 0 : index
    %156 = vector.load %arg2[%c11, %c0_72, %c0_73] : memref<12x32x8xf32, #tpu.memory_space<vmem>>, vector<1x32x8xf32>
    %157 = vector.shape_cast %156 : vector<1x32x8xf32> to vector<32x8xf32>
    %cst_74 = arith.constant dense<0.000000e+00> : vector<16x8xf32>
    %158 = tpu.matmul %40, %157, %cst_74 {dimension_numbers = #tpu.dot_dimension_numbers<[1], [0], [0], [1], [0, 0, 1, 1], [], []>} : vector<16x32xf32>, vector<32x8xf32>, vector<16x8xf32> -> vector<16x8xf32>
    %159 = vector.shape_cast %152 : vector<16x8xf32> to vector<2x8x8xf32>
    %160 = vector.shape_cast %155 : vector<16x8xf32> to vector<2x8x8xf32>
    %161 = vector.shape_cast %158 : vector<16x8xf32> to vector<2x8x8xf32>
    %cst_75 = arith.constant dense<0.000000e+00> : vector<2x8x8xf32>
    %162 = tpu.matmul %159, %160, %cst_75 {dimension_numbers = #tpu.dot_dimension_numbers<[2], [2], [1], [1], [0, 0, 0, 1, 1, 1], [0], [0]>} : vector<2x8x8xf32>, vector<2x8x8xf32>, vector<2x8x8xf32> -> vector<2x8x8xf32>
    %cst_76 = arith.constant 0.353553385 : f32
    %163 = vector.broadcast %cst_76 : f32 to vector<2x8x8xf32>
    %164 = arith.mulf %162, %163 : vector<2x8x8xf32>
    %165 = vector.shape_cast %46 : vector<8x8xf32> to vector<1x8x8xf32>
    %166 = vector.broadcast %165 : vector<1x8x8xf32> to vector<2x8x8xf32>
    %167 = arith.addf %164, %166 : vector<2x8x8xf32>
    %cst_77 = arith.constant dense<0xFF800000> : vector<2x8xf32>
    %168 = vector.multi_reduction <maximumf>, %167, %cst_77 [2] : vector<2x8x8xf32> to vector<2x8xf32>
    %169 = vector.shape_cast %168 : vector<2x8xf32> to vector<2x8x1xf32>
    %170 = vector.broadcast %169 : vector<2x8x1xf32> to vector<2x8x8xf32>
    %171 = arith.subf %167, %170 : vector<2x8x8xf32>
    %172 = math.exp %171 : vector<2x8x8xf32>
    %cst_78 = arith.constant dense<0.000000e+00> : vector<2x8xf32>
    %173 = vector.multi_reduction <add>, %172, %cst_78 [2] : vector<2x8x8xf32> to vector<2x8xf32>
    %174 = vector.shape_cast %173 : vector<2x8xf32> to vector<2x8x1xf32>
    %175 = tpu.reciprocal %174 {approx = true} : vector<2x8x1xf32> -> vector<2x8x1xf32>
    %176 = vector.broadcast %175 : vector<2x8x1xf32> to vector<2x8x8xf32>
    %177 = arith.mulf %172, %176 : vector<2x8x8xf32>
    %cst_79 = arith.constant dense<0.000000e+00> : vector<2x8x8xf32>
    %178 = tpu.matmul %177, %161, %cst_79 {dimension_numbers = #tpu.dot_dimension_numbers<[2], [1], [1], [2], [0, 0, 0, 1, 1, 2], [0], [0]>} : vector<2x8x8xf32>, vector<2x8x8xf32>, vector<2x8x8xf32> -> vector<2x8x8xf32>
    %179 = vector.shape_cast %178 : vector<2x8x8xf32> to vector<16x8xf32>
    %c3_80 = arith.constant 3 : index
    %c0_81 = arith.constant 0 : index
    %c0_82 = arith.constant 0 : index
    %180 = vector.load %arg3[%c3_80, %c0_81, %c0_82] : memref<4x8x32xf32, #tpu.memory_space<vmem>>, vector<1x8x32xf32>
    %181 = vector.shape_cast %180 : vector<1x8x32xf32> to vector<8x32xf32>
    %cst_83 = arith.constant dense<0.000000e+00> : vector<16x32xf32>
    %182 = tpu.matmul %179, %181, %cst_83 {dimension_numbers = #tpu.dot_dimension_numbers<[1], [0], [0], [1], [0, 0, 1, 1], [], []>} : vector<16x8xf32>, vector<8x32xf32>, vector<16x32xf32> -> vector<16x32xf32>
    %183 = arith.addf %149, %182 : vector<16x32xf32>
    %184 = vector.shape_cast %2 : vector<32xf32> to vector<1x32xf32>
    %185 = vector.broadcast %184 : vector<1x32xf32> to vector<16x32xf32>
    %186 = arith.addf %183, %185 : vector<16x32xf32>
    %187 = arith.addf %16, %186 : vector<16x32xf32>
    %cst_84 = arith.constant dense<0.000000e+00> : vector<16xf32>
    %188 = vector.multi_reduction <add>, %187, %cst_84 [1] : vector<16x32xf32> to vector<16xf32>
    %189 = vector.shape_cast %188 : vector<16xf32> to vector<16x1xf32>
    %cst_85 = arith.constant 3.200000e+01 : f32
    %190 = vector.broadcast %cst_85 : f32 to vector<16x1xf32>
    %191 = arith.divf %189, %190 : vector<16x1xf32>
    %192 = vector.broadcast %191 : vector<16x1xf32> to vector<16x32xf32>
    %193 = arith.subf %187, %192 : vector<16x32xf32>
    %194 = arith.mulf %193, %193 : vector<16x32xf32>
    %cst_86 = arith.constant dense<0.000000e+00> : vector<16xf32>
    %195 = vector.multi_reduction <add>, %194, %cst_86 [1] : vector<16x32xf32> to vector<16xf32>
    %196 = vector.shape_cast %195 : vector<16xf32> to vector<16x1xf32>
    %cst_87 = arith.constant 3.200000e+01 : f32
    %197 = vector.broadcast %cst_87 : f32 to vector<16x1xf32>
    %198 = arith.divf %196, %197 : vector<16x1xf32>
    %199 = vector.broadcast %191 : vector<16x1xf32> to vector<16x32xf32>
    %200 = arith.subf %187, %199 : vector<16x32xf32>
    %cst_88 = arith.constant 9.99999974E-6 : f32
    %201 = vector.broadcast %cst_88 : f32 to vector<16x1xf32>
    %202 = arith.addf %198, %201 : vector<16x1xf32>
    %203 = math.rsqrt %202 : vector<16x1xf32>
    %204 = vector.broadcast %203 : vector<16x1xf32> to vector<16x32xf32>
    %205 = arith.mulf %200, %204 : vector<16x32xf32>
    %206 = vector.shape_cast %8 : vector<32xf32> to vector<1x32xf32>
    %207 = vector.broadcast %206 : vector<1x32xf32> to vector<16x32xf32>
    %208 = arith.mulf %207, %205 : vector<16x32xf32>
    %209 = vector.shape_cast %10 : vector<32xf32> to vector<1x32xf32>
    %210 = vector.broadcast %209 : vector<1x32xf32> to vector<16x32xf32>
    %211 = arith.addf %208, %210 : vector<16x32xf32>
    %c0_89 = arith.constant 0 : index
    %c0_90 = arith.constant 0 : index
    %212 = vector.load %arg4[%c0_89, %c0_90] : memref<32x128xf32, #tpu.memory_space<vmem>>, vector<32x128xf32>
    %cst_91 = arith.constant dense<0.000000e+00> : vector<16x128xf32>
    %213 = tpu.matmul %211, %212, %cst_91 {dimension_numbers = #tpu.dot_dimension_numbers<[1], [0], [0], [1], [0, 0, 1, 1], [], []>} : vector<16x32xf32>, vector<32x128xf32>, vector<16x128xf32> -> vector<16x128xf32>
    %214 = vector.shape_cast %12 : vector<128xf32> to vector<1x128xf32>
    %215 = vector.broadcast %214 : vector<1x128xf32> to vector<16x128xf32>
    %216 = arith.addf %213, %215 : vector<16x128xf32>
    %217 = arith.mulf %216, %216 : vector<16x128xf32>
    %218 = arith.mulf %217, %216 : vector<16x128xf32>
    %cst_92 = arith.constant 5.000000e-01 : f32
    %219 = vector.broadcast %cst_92 : f32 to vector<16x128xf32>
    %220 = arith.mulf %219, %216 : vector<16x128xf32>
    %cst_93 = arith.constant 4.471500e-02 : f32
    %221 = vector.broadcast %cst_93 : f32 to vector<16x128xf32>
    %222 = arith.mulf %221, %218 : vector<16x128xf32>
    %223 = arith.addf %216, %222 : vector<16x128xf32>
    %cst_94 = arith.constant 0.797884583 : f32
    %224 = vector.broadcast %cst_94 : f32 to vector<16x128xf32>
    %225 = arith.mulf %224, %223 : vector<16x128xf32>
    %226 = math.tanh %225 : vector<16x128xf32>
    %cst_95 = arith.constant 1.000000e+00 : f32
    %227 = vector.broadcast %cst_95 : f32 to vector<16x128xf32>
    %228 = arith.addf %227, %226 : vector<16x128xf32>
    %229 = arith.mulf %220, %228 : vector<16x128xf32>
    %c0_96 = arith.constant 0 : index
    %c0_97 = arith.constant 0 : index
    %230 = vector.load %arg5[%c0_96, %c0_97] : memref<128x32xf32, #tpu.memory_space<vmem>>, vector<128x32xf32>
    %cst_98 = arith.constant dense<0.000000e+00> : vector<16x32xf32>
    %231 = tpu.matmul %229, %230, %cst_98 {dimension_numbers = #tpu.dot_dimension_numbers<[1], [0], [0], [1], [0, 0, 1, 1], [], []>} : vector<16x128xf32>, vector<128x32xf32>, vector<16x32xf32> -> vector<16x32xf32>
    %232 = vector.shape_cast %14 : vector<32xf32> to vector<1x32xf32>
    %233 = vector.broadcast %232 : vector<1x32xf32> to vector<16x32xf32>
    %234 = arith.addf %231, %233 : vector<16x32xf32>
    %235 = arith.addf %187, %234 : vector<16x32xf32>
    %236 = vector.shape_cast %235 : vector<16x32xf32> to vector<2x8x32xf32>
    %c0_99 = arith.constant 0 : index
    %c0_100 = arith.constant 0 : index
    %c0_101 = arith.constant 0 : index
    %237 = vector.load %arg7[%c0_99, %c0_100, %c0_101] : memref<2x8x32xf32, #tpu.memory_space<vmem>>, vector<2x8x32xf32>
    tpu.vector_store %arg7[%c0_99, %c0_100, %c0_101], %236 {strides = array<i32>} : memref<2x8x32xf32, #tpu.memory_space<vmem>>, vector<2x8x32xf32>,
    return
  }
  func.func @transform_0(%arg0: i32) -> (i32, i32, i32) {
    %c0_i32 = arith.constant 0 : i32
    %c0_i32_0 = arith.constant 0 : i32
    %c0_i32_1 = arith.constant 0 : i32
    return %arg0, %c0_i32, %c0_i32_0 : i32, i32, i32
  }
  func.func @transform_1(%arg0: i32) -> (i32, i32, i32) {
    %c0_i32 = arith.constant 0 : i32
    %c0_i32_0 = arith.constant 0 : i32
    %c0_i32_1 = arith.constant 0 : i32
    %c0_i32_2 = arith.constant 0 : i32
    return %c0_i32, %c0_i32_0, %c0_i32_1 : i32, i32, i32
  }
  func.func @transform_2(%arg0: i32) -> (i32, i32, i32) {
    %c0_i32 = arith.constant 0 : i32
    %c0_i32_0 = arith.constant 0 : i32
    %c0_i32_1 = arith.constant 0 : i32
    %c0_i32_2 = arith.constant 0 : i32
    return %c0_i32, %c0_i32_0, %c0_i32_1 : i32, i32, i32
  }
  func.func @transform_3(%arg0: i32) -> (i32, i32) {
    %c0_i32 = arith.constant 0 : i32
    %c0_i32_0 = arith.constant 0 : i32
    %c0_i32_1 = arith.constant 0 : i32
    return %c0_i32, %c0_i32_0 : i32, i32
  }
  func.func @transform_4(%arg0: i32) -> (i32, i32) {
    %c0_i32 = arith.constant 0 : i32
    %c0_i32_0 = arith.constant 0 : i32
    %c0_i32_1 = arith.constant 0 : i32
    return %c0_i32, %c0_i32_0 : i32, i32
  }
  func.func @transform_5(%arg0: i32) -> (i32, i32) {
    %c0_i32 = arith.constant 0 : i32
    %c0_i32_0 = arith.constant 0 : i32
    %c0_i32_1 = arith.constant 0 : i32
    return %c0_i32, %c0_i32_0 : i32, i32
  }
  func.func @transform_6(%arg0: i32) -> (i32, i32, i32) {
    %c0_i32 = arith.constant 0 : i32
    %c0_i32_0 = arith.constant 0 : i32
    %c0_i32_1 = arith.constant 0 : i32
    return %arg0, %c0_i32, %c0_i32_0 : i32, i32, i32
  }
}

</mosaic_0001>

<bundles_post_ra>
// kernel: tpu_custom_call.1
= control target key start
LH: loop header
LB: loop body
LE: loop exit
PB: predicated region body
PF: predicated region fallthrough
CT: control target
= control target key end

     0   :  { %vm27_vm0 = vcmask 261120   ;;  %s4032_s0 = inlined_call_operand.vmem [shape: f32[2,8,32], index: 0, kind: input, shape index: {}]   ;;  %s4033_s1 = inlined_call_operand.vmem [shape: f32[12,32,8], index: 1, kind: input, shape index: {}]   ;;  %s4034_s2 = inlined_call_operand.vmem [shape: f32[4,8,32], index: 2, kind: input, shape index: {}]   ;;  %s4035_s3 = inlined_call_operand.vmem [shape: f32[32,128], index: 3, kind: input, shape index: {}]   ;;  %s4036_s4 = inlined_call_operand.vmem [shape: f32[128,32], index: 4, kind: input, shape index: {}]   ;;  %s4037_s5 = inlined_call_operand.vmem [shape: f32[8,128], index: 5, kind: input, shape index: {}]   ;;  %s4038_s6 = inlined_call_operand.hbm [shape: f32[2,8,32], index: 6, kind: output, shape index: {}]  }
   0x1   :  { %v3576_v0 = vld [vmem:[%s4032_s0] sm:$0xff]  ;;  %v3581_v1 = vld [vmem:[%s4032_s0 + $0x8] sm:$0xff] }
   0x2   :  { %11 = vsyncpa [#allocation3], 0  ;;  %v28_v2 = vsel %vm27_vm0, %v3576_v0, 0.0  ;;  %v31_v3 = vsel %vm27_vm0, %v3581_v1, 0.0  ;;  %v76_v14 = vld [vmem:[%s4033_s1 + $0x18] sm:$0xff]  ;;  %v75_v15 = vld [vmem:[%s4033_s1 + $0x10] sm:$0xff]  ;;  %v55_v23 = vlaneseq }
   0x3   :  { %29 = vadd.xlane.f32.xlu0 %v28_v2  ;;  %3183 = vmatprep.subr.mxu0 %v76_v14  ;;  %v74_v16 = vld [vmem:[%s4033_s1 + $0x8] sm:$0xff]  ;;  %v73_v17 = vld [vmem:[%s4033_s1] sm:$0xff]  ;;  %v2943_v18 = vld [vmem:[%s4033_s1 + $0x98] sm:$0xff]  ;;  %v3533_v47 = vmov 0.0   ;;  %vm3534_vm1 = vmmov 0   ;;  %vm318_vm2 = vcmask 64512  }
   0x4   :  { %3184 = vmatpush3.msra.mxu0 %v76_v14  ;;  %v3607_v26 = vshrl.u32 %v55_v23, 7  ;;  %v3613_v28 = vld [vmem:[%s4037_s5] sm:$0xff]  ;;  %v2942_v40 = vld [vmem:[%s4033_s1 + $0x90] sm:$0xff]  ;;  %v2941_v41 = vld [vmem:[%s4033_s1 + $0x88] sm:$0xff]  ;;  %3221 = vmatprep.subr.mxu1 %v3533_v47  ;;  %v70_v54 = vand.u32 127, %v55_v23 }
   0x5   :  { %3185 = vmatprep.subr.mxu0 %v75_v15  ;;  %v2940_v42 = vld [vmem:[%s4033_s1 + $0x80] sm:$0xff]  ;;  %v2949_v43 = vld [vmem:[%s4033_s1 + $0x118] sm:$0xff]  ;;  %v2948_v44 = vld [vmem:[%s4033_s1 + $0x110] sm:$0xff]  ;;  %3223 = vmatprep.mubr.msk.f32.mxu1 %vm3534_vm1, %v3533_v47 }
   0x6   :  { %3186 = vmatpush3.msra.mxu0 %v75_v15  ;;  %v57_v27 = vsub.s32 1, %v3607_v26  ;;  %v63_v29 = vsub.s32 2, %v3607_v26  ;;  %v2947_v45 = vld [vmem:[%s4033_s1 + $0x108] sm:$0xff]  ;;  %v2946_v46 = vld [vmem:[%s4033_s1 + $0x100] sm:$0xff]  ;;  %vm71_vm3 = vcmp.gt.s32.totalorder %v70_v54, %v3607_v26  ;;  %v2967_v14 = vld [vmem:[%s4033_s1 + $0xb8] sm:$0xff] }
   0x7   :  { %32 = vadd.xlane.f32.xlu0 %v31_v3  ;;  %3187 = vmatprep.subr.mxu0 %v74_v16  ;;  %v3674_v56 = vsel %vm71_vm3, -1e+30, %v3533_v47  ;;  %v2961_v15 = vld [vmem:[%s4033_s1 + $0x38] sm:$0xff]  ;;  %v2960_v23 = vld [vmem:[%s4033_s1 + $0x30] sm:$0xff] }
   0x8   :  { %3188 = vmatpush3.msra.mxu0 %v74_v16  ;;  %v58_v30 = vrot.slane %v3613_v28, %v57_v27  ;;  %v64_v33 = vrot.slane %v3613_v28, %v63_v29  ;;  %v2964_v27 = vld [vmem:[%s4033_s1 + $0xa0] sm:$0xff] }
   0x9   :  { %3189 = vmatprep.subr.mxu0 %v73_v17  ;;  %v2958_v29 = vld [vmem:[%s4033_s1 + $0x20] sm:$0xff] }
   0xa   :  { %3190 = vmatpush3.msra.mxu0 %v73_v17 }
   0xb   :  { %3194 = vmatprep.subr.mxu0 %v2943_v18 }
  0x8c   :  { %v30_v4 = vpop.xlane.xlu0 %29 }
  0x8d   :  { %v35_v5 = vmul.f32 0.03125, %v30_v4 }
  0x8f   :  { %v37_v6 = vsub.f32 %v3576_v0, %v35_v5 }
  0x90   :  { %v33_v7 = vpop.xlane.xlu0 %32 }
  0x91   :  { %v36_v8 = vmul.f32 0.03125, %v33_v7  ;;  %v39_v9 = vmul.f32 %v37_v6, %v37_v6 }
  0x93   :  { %v38_v10 = vsub.f32 %v3581_v1, %v36_v8  ;;  %v41_v11 = vsel %vm27_vm0, %v39_v9, 0.0 }
  0x94   :  { %42 = vadd.xlane.f32.xlu1 %v41_v11 }
  0x95   :  { %v40_v12 = vmul.f32 %v38_v10, %v38_v10 }
  0x97   :  { %v44_v13 = vsel %vm27_vm0, %v40_v12, 0.0 }
  0x98   :  { %45 = vadd.xlane.f32.xlu1 %v44_v13 }
 0x11d   :  { %v43_v19 = vpop.xlane.xlu1 %42 }
 0x11e   :  { %v47_v20 = vmul.f32 0.03125, %v43_v19 }
 0x120   :  { %v49_v21 = vadd.f32 1e-05, %v47_v20 }
 0x121   :  { %v46_v22 = vpop.xlane.xlu1 %45 }
 0x122   :  { %3466 = vrsqrt.f32 %v49_v21  ;;  %v48_v24 = vmul.f32 0.03125, %v46_v22  ;;  %v2966_v21 = vld [vmem:[%s4033_s1 + $0xb0] sm:$0xff] }
 0x124   :  { %v50_v25 = vadd.f32 1e-05, %v48_v24  ;;  %v2965_v24 = vld [vmem:[%s4033_s1 + $0xa8] sm:$0xff] }
 0x126   :  { %3468 = vrsqrt.f32 %v50_v25  ;;  %v2959_v25 = vld [vmem:[%s4033_s1 + $0x28] sm:$0xff] }
 0x12f   :  { %v3467_v31 = vpop.eup %3466 }
 0x130   :  { %v53_v32 = vmul.f32 %v3467_v31, %v37_v6  ;;  %v2972_v31 = vld [vmem:[%s4033_s1 + $0x130] sm:$0xff] }
 0x132   :  { %v59_v34 = vmul.f32 %v58_v30, %v53_v32  ;;  %v2971_v32 = vld [vmem:[%s4033_s1 + $0x128] sm:$0xff] }
 0x133   :  { %v3469_v35 = vpop.eup %3468 }
 0x134   :  { %v3618_v36 = vadd.f32 %v64_v33, %v59_v34  ;;  %v54_v37 = vmul.f32 %v3469_v35, %v38_v10 }
 0x136   :  { %v60_v38 = vmul.f32 %v58_v30, %v54_v37  ;;  %3191 = vmatprep.mubr.msk.f32.mxu0 %vm27_vm0, %v3618_v36  ;;  %v2973_v30 = vld [vmem:[%s4033_s1 + $0x138] sm:$0xff] }
 0x138   :  { %v3622_v39 = vadd.f32 %v64_v33, %v60_v38  ;;  %v2970_v33 = vld [vmem:[%s4033_s1 + $0x120] sm:$0xff] }
 0x13a   :  { %3192 = vmatmul.mubr.msk.f32.vlgmr.msra.gmra.mxu0 %vm27_vm0, %v3622_v39 }
 0x13b   :  { %3195 = vmatpush3.msra.mxu0 %v2943_v18  ;;  %3202 = vmatprep.mubr.msk.f32.mxu0 %vm27_vm0, %v3618_v36 }
 0x13c   :  { %3196 = vmatprep.subr.mxu0 %v2942_v40 }
 0x13d   :  { %3197 = vmatpush3.msra.mxu0 %v2942_v40 }
 0x13e   :  { %3198 = vmatprep.subr.mxu0 %v2941_v41 }
 0x13f   :  { %3199 = vmatpush3.msra.mxu0 %v2941_v41 }
 0x140   :  { %3200 = vmatprep.subr.mxu0 %v2940_v42 }
 0x141   :  { %3201 = vmatpush3.msra.mxu0 %v2940_v42 }
 0x142   :  { %3203 = vmatmul.mubr.msk.f32.vlgmr.msra.gmra.mxu0 %vm27_vm0, %v3622_v39  ;;  %3205 = vmatprep.subr.mxu0 %v2949_v43 }
 0x143   :  { %3206 = vmatpush3.msra.mxu0 %v2949_v43  ;;  %3213 = vmatprep.mubr.msk.f32.mxu0 %vm27_vm0, %v3618_v36 }
 0x144   :  { %3207 = vmatprep.subr.mxu0 %v2948_v44 }
 0x145   :  { %3208 = vmatpush3.msra.mxu0 %v2948_v44 }
 0x146   :  { %3209 = vmatprep.subr.mxu0 %v2947_v45 }
 0x147   :  { %3210 = vmatpush3.msra.mxu0 %v2947_v45 }
 0x148   :  { %3211 = vmatprep.subr.mxu0 %v2946_v46 }
 0x149   :  { %3212 = vmatpush3.msra.mxu0 %v2946_v46 }
 0x14a   :  { %3214 = vmatmul.mubr.msk.f32.vlgmr.msra.gmra.mxu0 %vm27_vm0, %v3622_v39  ;;  %3216 = vmatprep.subr.mxu0 %v3533_v47 }
 0x14b   :  { %3218 = vmatprep.mubr.msk.f32.mxu0 %vm3534_vm1, %v3533_v47 }
 0x1fa   :  { %v3193_v48 = vpop.f32.mrf.mxu0 }
 0x1fc   :  { %v149_v49 = vpop.f32.mrf.mxu0 }
 0x202   :  { %v3204_v50 = vpop.f32.mrf.mxu0 }
 0x203   :  { %3222 = vmatpush3.xpose.msk.msra.mxu1 %vm318_vm2, %v3204_v50 }
 0x204   :  { %v229_v51 = vpop.f32.mrf.mxu0  ;;  %3231 = vmatprep.subr.mxu1 %v3533_v47 }
 0x205   :  { %3217 = vmatpush3.xpose.msk.msra.mxu0 %vm318_vm2, %v229_v51 }
 0x206   :  { %3224 = vmatmul.mubr.msk.f32.vlgmr.msra.gmra.mxu1 %vm318_vm2, %v3193_v48  ;;  %3226 = vmatprep.subr.mxu0 %v3533_v47 }
 0x207   :  { %3233 = vmatprep.mubr.msk.f32.mxu1 %vm3534_vm1, %v3533_v47 }
 0x208   :  { %3219 = vmatmul.mubr.msk.f32.vlgmr.msra.gmra.mxu0 %vm318_vm2, %v149_v49 }
 0x209   :  { %3228 = vmatprep.mubr.msk.f32.mxu0 %vm3534_vm1, %v3533_v47 }
 0x20a   :  { %v3215_v52 = vpop.f32.mrf.mxu0 }
 0x20b   :  { %3232 = vmatpush3.msra.mxu1 %v3215_v52 }
 0x20c   :  { %v309_v53 = vpop.f32.mrf.mxu0  ;;  %3247 = vmatprep.subr.mxu1 %v2967_v14 }
 0x20d   :  { %3227 = vmatpush3.msra.mxu0 %v309_v53 }
 0x20e   :  { %3236 = vmatprep.subr.mxu0 %v2961_v15 }
 0x2c6   :  { %v467_v55 = vpop.f32.mrf.mxu1 }
 0x2c7   :  { %v472_v57 = vmul.f32 0.35355338, %v467_v55 }
 0x2c8   :  { %v391_v58 = vpop.f32.mrf.mxu0  ;;  %v3225_v59 = vpop.f32.mrf.mxu1 }
 0x2c9   :  { %v471_v60 = vmul.f32 0.35355338, %v391_v58  ;;  %v474_v61 = vadd.f32 %v472_v57, %v3674_v56 }
 0x2ca   :  { %v3220_v62 = vpop.f32.mrf.mxu0 }
 0x2cb   :  { %v478_v63 = vsel %vm318_vm2, %v474_v61, -inf  ;;  %v473_v2 = vadd.f32 %v471_v60, %v3674_v56 }
 0x2cc   :  { %479 = vmax.xlane.f32.xlu0 %v478_v63 }
 0x2cd   :  { %v475_v3 = vsel %vm318_vm2, %v473_v2, -inf }
 0x2ce   :  { %476 = vmax.xlane.f32.xlu1 %v475_v3 }
 0x355   :  { %v480_v4 = vpop.xlane.xlu0 %479 }
 0x356   :  { %v482_v5 = vsub.f32 %v474_v61, %v480_v4 }
 0x357   :  { %v477_v6 = vpop.xlane.xlu1 %476 }
 0x358   :  { %v485_v7 = vmul.f32 1.442695, %v482_v5  ;;  %v481_v8 = vsub.f32 %v473_v2, %v477_v6  ;;  %v643_v6 = vld [vmem:[%s4034_s2] sm:$0xff] }
 0x35a   :  { %3470 = vpow2.f32 %v485_v7  ;;  %v483_v9 = vmul.f32 1.442695, %v481_v8 }
 0x35c   :  { %3472 = vpow2.f32 %v483_v9 }
 0x367   :  { %v3471_v10 = vpop.eup %3470 }
 0x368   :  { %v490_v11 = vsel %vm318_vm2, %v3471_v10, 0.0 }
 0x369   :  { %v3473_v12 = vpop.eup %3472  ;;  %491 = vadd.xlane.f32.xlu0 %v490_v11 }
 0x36a   :  { %v487_v13 = vsel %vm318_vm2, %v3473_v12, 0.0 }
 0x36b   :  { %488 = vadd.xlane.f32.xlu1 %v487_v13  ;;  %v2996_v13 = vld [vmem:[%s4033_s1 + $0xd8] sm:$0xff] }
 0x3f2   :  { %v492_v16 = vpop.xlane.xlu0 %491 }
 0x3f3   :  { %3474 = vrcp.f32 %v492_v16  ;;  %v2993_v16 = vld [vmem:[%s4033_s1 + $0xc0] sm:$0xff] }
 0x3f4   :  { %v489_v17 = vpop.xlane.xlu1 %488 }
 0x3f5   :  { %3476 = vrcp.f32 %v489_v17  ;;  %v2982_v17 = vld [vmem:[%s4034_s2 + $0x8] sm:$0xff] }
 0x400   :  { %v3475_v18 = vpop.eup %3474 }
 0x401   :  { %v496_v19 = vmul.f32 %v3475_v18, %v3471_v10  ;;  %v2990_v18 = vld [vmem:[%s4033_s1 + $0x58] sm:$0xff] }
 0x402   :  { %v3477_v20 = vpop.eup %3476 }
 0x403   :  { %3234 = vmatmul.mubr.msk.f32.vlgmr.msra.gmra.mxu1 %vm318_vm2, %v496_v19  ;;  %v495_v22 = vmul.f32 %v3477_v20, %v3473_v12 }
 0x404   :  { %3248 = vmatpush3.msra.mxu1 %v2967_v14  ;;  %3255 = vmatprep.mubr.msk.f32.mxu1 %vm27_vm0, %v3618_v36  ;;  %v2995_v14 = vld [vmem:[%s4033_s1 + $0xd0] sm:$0xff] }
 0x405   :  { %3249 = vmatprep.subr.mxu1 %v2966_v21  ;;  %3229 = vmatmul.mubr.msk.f32.vlgmr.msra.gmra.mxu0 %vm318_vm2, %v495_v22  ;;  %v2989_v22 = vld [vmem:[%s4033_s1 + $0x50] sm:$0xff] }
 0x406   :  { %3237 = vmatpush3.msra.mxu0 %v2961_v15  ;;  %3250 = vmatpush3.msra.mxu1 %v2966_v21  ;;  %v2994_v15 = vld [vmem:[%s4033_s1 + $0xc8] sm:$0xff] }
 0x407   :  { %3238 = vmatprep.subr.mxu0 %v2960_v23  ;;  %3244 = vmatprep.mubr.msk.f32.mxu0 %vm27_vm0, %v3618_v36 }
 0x408   :  { %3251 = vmatprep.subr.mxu1 %v2965_v24  ;;  %3239 = vmatpush3.msra.mxu0 %v2960_v23 }
 0x409   :  { %3252 = vmatpush3.msra.mxu1 %v2965_v24  ;;  %3240 = vmatprep.subr.mxu0 %v2959_v25  ;;  %v2988_v24 = vld [vmem:[%s4033_s1 + $0x48] sm:$0xff] }
 0x40a   :  { %3253 = vmatprep.subr.mxu1 %v2964_v27  ;;  %3241 = vmatpush3.msra.mxu0 %v2959_v25  ;;  %v2987_v25 = vld [vmem:[%s4033_s1 + $0x40] sm:$0xff] }
 0x40b   :  { %3254 = vmatpush3.msra.mxu1 %v2964_v27  ;;  %3242 = vmatprep.subr.mxu0 %v2958_v29 }
 0x40c   :  { %3256 = vmatmul.mubr.msk.f32.vlgmr.msra.gmra.mxu1 %vm27_vm0, %v3622_v39  ;;  %3243 = vmatpush3.msra.mxu0 %v2958_v29  ;;  %v3002_v29 = vld [vmem:[%s4033_s1 + $0x158] sm:$0xff] }
 0x40d   :  { %3245 = vmatmul.mubr.msk.f32.vlgmr.msra.gmra.mxu0 %vm27_vm0, %v3622_v39  ;;  %3258 = vmatprep.subr.mxu0 %v2973_v30 }
 0x40e   :  { %3259 = vmatpush3.msra.mxu0 %v2973_v30  ;;  %3266 = vmatprep.mubr.msk.f32.mxu0 %vm27_vm0, %v3618_v36  ;;  %v3001_v30 = vld [vmem:[%s4033_s1 + $0x150] sm:$0xff] }
 0x40f   :  { %3260 = vmatprep.subr.mxu0 %v2972_v31  ;;  %3269 = vmatprep.subr.mxu1 %v3533_v47 }
 0x410   :  { %3261 = vmatpush3.msra.mxu0 %v2972_v31  ;;  %3271 = vmatprep.mubr.msk.f32.mxu1 %vm3534_vm1, %v3533_v47 }
 0x411   :  { %3262 = vmatprep.subr.mxu0 %v2971_v32 }
 0x412   :  { %3263 = vmatpush3.msra.mxu0 %v2971_v32  ;;  %v3000_v32 = vld [vmem:[%s4033_s1 + $0x148] sm:$0xff] }
 0x413   :  { %3264 = vmatprep.subr.mxu0 %v2970_v33 }
 0x414   :  { %3265 = vmatpush3.msra.mxu0 %v2970_v33 }
 0x415   :  { %3267 = vmatmul.mubr.msk.f32.vlgmr.msra.gmra.mxu0 %vm27_vm0, %v3622_v39  ;;  %3279 = vmatprep.subr.mxu0 %v3533_v47 }
 0x416   :  { %3281 = vmatprep.mubr.msk.f32.mxu0 %vm3534_vm1, %v3533_v47 }
 0x4c3   :  { %v3738_v34 = vpop.f32.mrf.mxu1 }
 0x4c5   :  { %v566_v35 = vpop.f32.mrf.mxu0  ;;  %v3235_v37 = vpop.f32.mrf.mxu1 }
 0x4c7   :  { %v3230_v38 = vpop.f32.mrf.mxu0 }
 0x4cc   :  { %v3257_v40 = vpop.f32.mrf.mxu1 }
 0x4cd   :  { %v3246_v41 = vpop.f32.mrf.mxu0 }
 0x4ce   :  { %v795_v42 = vpop.f32.mrf.mxu1 }
 0x4cf   :  { %3270 = vmatpush3.xpose.msk.msra.mxu1 %vm318_vm2, %v795_v42  ;;  %v715_v43 = vpop.f32.mrf.mxu0 }
 0x4d0   :  { %3274 = vmatprep.subr.mxu1 %v3533_v47 }
 0x4d2   :  { %3272 = vmatmul.mubr.msk.f32.vlgmr.msra.gmra.mxu1 %vm318_vm2, %v715_v43 }
 0x4d3   :  { %3275 = vmatpush3.xpose.msk.msra.mxu1 %vm318_vm2, %v3257_v40  ;;  %3276 = vmatprep.mubr.msk.f32.mxu1 %vm3534_vm1, %v3533_v47 }
 0x4d4   :  { %3284 = vmatprep.subr.mxu1 %v3533_v47 }
 0x4d5   :  { %v3268_v44 = vpop.f32.mrf.mxu0 }
 0x4d6   :  { %3277 = vmatmul.mubr.msk.f32.vlgmr.msra.gmra.mxu1 %vm318_vm2, %v3246_v41 }
 0x4d7   :  { %3285 = vmatpush3.msra.mxu1 %v3268_v44  ;;  %v875_v45 = vpop.f32.mrf.mxu0  ;;  %3286 = vmatprep.mubr.msk.f32.mxu1 %vm3534_vm1, %v3533_v47 }
 0x4d8   :  { %3280 = vmatpush3.msra.mxu0 %v875_v45  ;;  %3294 = vmatprep.subr.mxu1 %v643_v6 }
 0x4d9   :  { %3289 = vmatprep.subr.mxu0 %v2982_v17 }
 0x592   :  { %v956_v46 = vpop.f32.mrf.mxu1 }
 0x593   :  { %v1036_v48 = vmul.f32 0.35355338, %v956_v46 }
 0x594   :  { %v3273_v49 = vpop.f32.mrf.mxu1 }
 0x595   :  { %v1038_v50 = vadd.f32 %v1036_v48, %v3674_v56 }
 0x596   :  { %v1032_v51 = vpop.f32.mrf.mxu1 }
 0x597   :  { %v1037_v52 = vmul.f32 0.35355338, %v1032_v51  ;;  %v1040_v53 = vsel %vm318_vm2, %v1038_v50, -inf }
 0x598   :  { %1041 = vmax.xlane.f32.xlu0 %v1040_v53  ;;  %v3278_v54 = vpop.f32.mrf.mxu1 }
 0x599   :  { %v1039_v55 = vadd.f32 %v1037_v52, %v3674_v56 }
 0x59b   :  { %v1043_v57 = vsel %vm318_vm2, %v1039_v55, -inf }
 0x59c   :  { %1044 = vmax.xlane.f32.xlu1 %v1043_v57 }
 0x621   :  { %v1042_v58 = vpop.xlane.xlu0 %1041 }
 0x622   :  { %v1046_v59 = vsub.f32 %v1038_v50, %v1042_v58 }
 0x624   :  { %v1048_v60 = vmul.f32 1.442695, %v1046_v59 }
 0x625   :  { %v1045_v61 = vpop.xlane.xlu1 %1044 }
 0x626   :  { %3478 = vpow2.f32 %v1048_v60  ;;  %v1047_v62 = vsub.f32 %v1039_v55, %v1045_v61 }
 0x628   :  { %v1050_v63 = vmul.f32 1.442695, %v1047_v62 }
 0x62a   :  { %3480 = vpow2.f32 %v1050_v63 }
 0x633   :  { %v3479_v2 = vpop.eup %3478 }
 0x634   :  { %v1052_v3 = vsel %vm318_vm2, %v3479_v2, 0.0 }
 0x635   :  { %1053 = vadd.xlane.f32.xlu0 %v1052_v3 }
 0x637   :  { %v3481_v4 = vpop.eup %3480 }
 0x638   :  { %v1055_v5 = vsel %vm318_vm2, %v3481_v4, 0.0 }
 0x639   :  { %1056 = vadd.xlane.f32.xlu1 %v1055_v5 }
 0x6be   :  { %v1054_v7 = vpop.xlane.xlu0 %1053 }
 0x6bf   :  { %3482 = vrcp.f32 %v1054_v7 }
 0x6c2   :  { %v1057_v8 = vpop.xlane.xlu1 %1056 }
 0x6c3   :  { %3484 = vrcp.f32 %v1057_v8 }
 0x6cc   :  { %v3483_v9 = vpop.eup %3482 }
 0x6cd   :  { %v1060_v10 = vmul.f32 %v3483_v9, %v3479_v2 }
 0x6cf   :  { %3282 = vmatmul.mubr.msk.f32.vlgmr.msra.gmra.mxu0 %vm318_vm2, %v1060_v10 }
 0x6d0   :  { %v3485_v11 = vpop.eup %3484  ;;  %3290 = vmatpush3.msra.mxu0 %v2982_v17  ;;  %v3026_v17 = vld [vmem:[%s4033_s1 + $0x160] sm:$0xff] }
 0x6d1   :  { %v1061_v12 = vmul.f32 %v3485_v11, %v3481_v4  ;;  %3299 = vmatprep.subr.mxu0 %v2990_v18  ;;  %v3017_v4 = vld [vmem:[%s4033_s1 + $0x78] sm:$0xff]  ;;  %v3016_v11 = vld [vmem:[%s4033_s1 + $0x70] sm:$0xff] }
 0x6d3   :  { %3287 = vmatmul.mubr.msk.f32.vlgmr.msra.gmra.mxu1 %vm318_vm2, %v1061_v12  ;;  %v3015_v12 = vld [vmem:[%s4033_s1 + $0x68] sm:$0xff] }
 0x6d4   :  { %3296 = vmatprep.mubr.msk.f32.mxu1 %vm318_vm2, %v566_v35  ;;  %3295 = vmatpush3.msra.mxu1 %v643_v6 }
 0x6d5   :  { %3310 = vmatprep.subr.mxu1 %v2996_v13 }
 0x6d7   :  { %3297 = vmatmul.mubr.msk.f32.vlgmr.msra.gmra.mxu1 %vm318_vm2, %v3738_v34  ;;  %v2999_v34 = vld [vmem:[%s4033_s1 + $0x140] sm:$0xff] }
 0x6d8   :  { %3311 = vmatpush3.msra.mxu1 %v2996_v13  ;;  %3318 = vmatprep.mubr.msk.f32.mxu1 %vm27_vm0, %v3618_v36  ;;  %v3014_v13 = vld [vmem:[%s4033_s1 + $0x60] sm:$0xff] }
 0x6d9   :  { %3312 = vmatprep.subr.mxu1 %v2995_v14 }
 0x6da   :  { %3313 = vmatpush3.msra.mxu1 %v2995_v14  ;;  %v3029_v14 = vld [vmem:[%s4033_s1 + $0x178] sm:$0xff] }
 0x6db   :  { %3314 = vmatprep.subr.mxu1 %v2994_v15 }
 0x6dc   :  { %3315 = vmatpush3.msra.mxu1 %v2994_v15  ;;  %v3028_v15 = vld [vmem:[%s4033_s1 + $0x170] sm:$0xff] }
 0x6dd   :  { %3316 = vmatprep.subr.mxu1 %v2993_v16 }
 0x6de   :  { %3317 = vmatpush3.msra.mxu1 %v2993_v16  ;;  %v3027_v16 = vld [vmem:[%s4033_s1 + $0x168] sm:$0xff] }
 0x6df   :  { %3319 = vmatmul.mubr.msk.f32.vlgmr.msra.gmra.mxu1 %vm27_vm0, %v3622_v39  ;;  %3332 = vmatprep.subr.mxu1 %v3533_v47 }
 0x6e0   :  { %3334 = vmatprep.mubr.msk.f32.mxu1 %vm3534_vm1, %v3533_v47 }
 0x78f   :  { %v1131_v19 = vpop.f32.mrf.mxu0 }
 0x790   :  { %3291 = vmatprep.mubr.msk.f32.mxu0 %vm318_vm2, %v1131_v19  ;;  %v3023_v19 = vld [vmem:[%s4033_s1 + $0xf8] sm:$0xff] }
 0x791   :  { %v3283_v20 = vpop.f32.mrf.mxu0 }
 0x793   :  { %v1204_v21 = vpop.f32.mrf.mxu1 }
 0x794   :  { %3292 = vmatmul.mubr.msk.f32.vlgmr.msra.gmra.mxu0 %vm318_vm2, %v1204_v21 }
 0x795   :  { %3300 = vmatpush3.msra.mxu0 %v2990_v18  ;;  %v3288_v23 = vpop.f32.mrf.mxu1  ;;  %3307 = vmatprep.mubr.msk.f32.mxu0 %vm27_vm0, %v3618_v36  ;;  %v3011_v18 = vld [vmem:[%s4034_s2 + $0x10] sm:$0xff] }
 0x796   :  { %3301 = vmatprep.subr.mxu0 %v2989_v22  ;;  %v3022_v23 = vld [vmem:[%s4033_s1 + $0xf0] sm:$0xff] }
 0x797   :  { %3302 = vmatpush3.msra.mxu0 %v2989_v22  ;;  %v3802_v27 = vpop.f32.mrf.mxu1 }
 0x798   :  { %3303 = vmatprep.subr.mxu0 %v2988_v24 }
 0x799   :  { %3304 = vmatpush3.msra.mxu0 %v2988_v24  ;;  %v3812_v31 = vpop.f32.mrf.mxu1 }
 0x79a   :  { %3305 = vmatprep.subr.mxu0 %v2987_v25 }
 0x79b   :  { %3306 = vmatpush3.msra.mxu0 %v2987_v25  ;;  %v3021_v25 = vld [vmem:[%s4033_s1 + $0xe8] sm:$0xff] }
 0x79c   :  { %3308 = vmatmul.mubr.msk.f32.vlgmr.msra.gmra.mxu0 %vm27_vm0, %v3622_v39  ;;  %3321 = vmatprep.subr.mxu0 %v3002_v29 }
 0x79d   :  { %3322 = vmatpush3.msra.mxu0 %v3002_v29  ;;  %3329 = vmatprep.mubr.msk.f32.mxu0 %vm27_vm0, %v3618_v36  ;;  %v3020_v29 = vld [vmem:[%s4033_s1 + $0xe0] sm:$0xff] }
 0x79e   :  { %3323 = vmatprep.subr.mxu0 %v3001_v30 }
 0x79f   :  { %v3320_v33 = vpop.f32.mrf.mxu1  ;;  %3324 = vmatpush3.msra.mxu0 %v3001_v30 }
 0x7a0   :  { %3325 = vmatprep.subr.mxu0 %v3000_v32 }
 0x7a1   :  { %v1523_v35 = vpop.f32.mrf.mxu1  ;;  %3326 = vmatpush3.msra.mxu0 %v3000_v32 }
 0x7a2   :  { %3327 = vmatprep.subr.mxu0 %v2999_v34  ;;  %3333 = vmatpush3.xpose.msk.msra.mxu1 %vm318_vm2, %v1523_v35 }
 0x7a3   :  { %3328 = vmatpush3.msra.mxu0 %v2999_v34  ;;  %3337 = vmatprep.subr.mxu1 %v3533_v47 }
 0x7a4   :  { %3330 = vmatmul.mubr.msk.f32.vlgmr.msra.gmra.mxu0 %vm27_vm0, %v3622_v39  ;;  %3342 = vmatprep.subr.mxu0 %v3533_v47 }
 0x7a5   :  { %3344 = vmatprep.mubr.msk.f32.mxu0 %vm3534_vm1, %v3533_v47 }
 0x854   :  { %v3829_v37 = vpop.f32.mrf.mxu0 }
 0x855   :  { %v1369_v34 = vadd.f32 %v3802_v27, %v3829_v37 }
 0x856   :  { %v3831_v38 = vpop.f32.mrf.mxu0 }
 0x85c   :  { %v3309_v40 = vpop.f32.mrf.mxu0 }
 0x85e   :  { %v1443_v41 = vpop.f32.mrf.mxu0 }
 0x85f   :  { %3335 = vmatmul.mubr.msk.f32.vlgmr.msra.gmra.mxu1 %vm318_vm2, %v1443_v41 }
 0x860   :  { %3338 = vmatpush3.xpose.msk.msra.mxu1 %vm318_vm2, %v3320_v33  ;;  %3339 = vmatprep.mubr.msk.f32.mxu1 %vm3534_vm1, %v3533_v47 }
 0x861   :  { %3347 = vmatprep.subr.mxu1 %v3533_v47 }
 0x863   :  { %3340 = vmatmul.mubr.msk.f32.vlgmr.msra.gmra.mxu1 %vm318_vm2, %v3309_v40  ;;  %v1364_v40 = vadd.f32 %v3812_v31, %v3831_v38 }
 0x864   :  { %v3331_v42 = vpop.f32.mrf.mxu0  ;;  %3349 = vmatprep.mubr.msk.f32.mxu1 %vm3534_vm1, %v3533_v47 }
 0x865   :  { %3348 = vmatpush3.msra.mxu1 %v3331_v42 }
 0x866   :  { %v1603_v43 = vpop.f32.mrf.mxu0  ;;  %3357 = vmatprep.subr.mxu1 %v3017_v4 }
 0x867   :  { %3343 = vmatpush3.msra.mxu0 %v1603_v43 }
 0x868   :  { %3352 = vmatprep.subr.mxu0 %v3011_v18 }
 0x91f   :  { %v1684_v44 = vpop.f32.mrf.mxu1 }
 0x920   :  { %v1764_v45 = vmul.f32 0.35355338, %v1684_v44 }
 0x921   :  { %v3336_v46 = vpop.f32.mrf.mxu1 }
 0x922   :  { %v1766_v48 = vadd.f32 %v1764_v45, %v3674_v56 }
 0x923   :  { %v1760_v49 = vpop.f32.mrf.mxu1 }
 0x924   :  { %v1765_v50 = vmul.f32 0.35355338, %v1760_v49  ;;  %v1768_v51 = vsel %vm318_vm2, %v1766_v48, -inf }
 0x925   :  { %1769 = vmax.xlane.f32.xlu0 %v1768_v51  ;;  %v3341_v52 = vpop.f32.mrf.mxu1 }
 0x926   :  { %v1767_v53 = vadd.f32 %v1765_v50, %v3674_v56 }
 0x928   :  { %v1771_v54 = vsel %vm318_vm2, %v1767_v53, -inf }
 0x929   :  { %1772 = vmax.xlane.f32.xlu1 %v1771_v54 }
 0x9ae   :  { %v1770_v55 = vpop.xlane.xlu0 %1769 }
 0x9af   :  { %v1774_v57 = vsub.f32 %v1766_v48, %v1770_v55 }
 0x9b1   :  { %v1776_v58 = vmul.f32 1.442695, %v1774_v57 }
 0x9b2   :  { %v1773_v59 = vpop.xlane.xlu1 %1772 }
 0x9b3   :  { %3486 = vpow2.f32 %v1776_v58  ;;  %v1775_v60 = vsub.f32 %v1767_v53, %v1773_v59 }
 0x9b5   :  { %v1778_v61 = vmul.f32 1.442695, %v1775_v60 }
 0x9b7   :  { %3488 = vpow2.f32 %v1778_v61 }
 0x9c0   :  { %v3487_v62 = vpop.eup %3486 }
 0x9c1   :  { %v1780_v63 = vsel %vm318_vm2, %v3487_v62, 0.0 }
 0x9c2   :  { %1781 = vadd.xlane.f32.xlu0 %v1780_v63 }
 0x9c4   :  { %v3489_v2 = vpop.eup %3488 }
 0x9c5   :  { %v1783_v3 = vsel %vm318_vm2, %v3489_v2, 0.0 }
 0x9c6   :  { %1784 = vadd.xlane.f32.xlu1 %v1783_v3 }
 0xa4b   :  { %v1782_v5 = vpop.xlane.xlu0 %1781 }
 0xa4c   :  { %3490 = vrcp.f32 %v1782_v5  ;;  %v3038_v5 = vld [vmem:[%s4034_s2 + $0x18] sm:$0xff] }
 0xa4f   :  { %v1785_v6 = vpop.xlane.xlu1 %1784 }
 0xa50   :  { %3492 = vrcp.f32 %v1785_v6 }
 0xa59   :  { %v3491_v7 = vpop.eup %3490 }
 0xa5a   :  { %v1788_v8 = vmul.f32 %v3491_v7, %v3487_v62 }
 0xa5c   :  { %3345 = vmatmul.mubr.msk.f32.vlgmr.msra.gmra.mxu0 %vm318_vm2, %v1788_v8 }
 0xa5d   :  { %v3493_v9 = vpop.eup %3492  ;;  %3353 = vmatpush3.msra.mxu0 %v3011_v18 }
 0xa5e   :  { %v1789_v10 = vmul.f32 %v3493_v9, %v3489_v2  ;;  %3368 = vmatprep.subr.mxu0 %v3023_v19 }
 0xa60   :  { %3350 = vmatmul.mubr.msk.f32.vlgmr.msra.gmra.mxu1 %vm318_vm2, %v1789_v10  ;;  %v2672_v10 = vsub.s32 0, %v3607_v26 }
 0xa61   :  { %3358 = vmatpush3.msra.mxu1 %v3017_v4  ;;  %3365 = vmatprep.mubr.msk.f32.mxu1 %vm27_vm0, %v3618_v36 }
 0xa62   :  { %3359 = vmatprep.subr.mxu1 %v3016_v11 }
 0xa63   :  { %3360 = vmatpush3.msra.mxu1 %v3016_v11  ;;  %v2673_v11 = vrot.slane %v3613_v28, %v2672_v10 }
 0xa64   :  { %3361 = vmatprep.subr.mxu1 %v3015_v12 }
 0xa65   :  { %3362 = vmatpush3.msra.mxu1 %v3015_v12 }
 0xa66   :  { %3363 = vmatprep.subr.mxu1 %v3014_v13 }
 0xa67   :  { %3364 = vmatpush3.msra.mxu1 %v3014_v13 }
 0xa68   :  { %3366 = vmatmul.mubr.msk.f32.vlgmr.msra.gmra.mxu1 %vm27_vm0, %v3622_v39  ;;  %3379 = vmatprep.subr.mxu1 %v3029_v14 }
 0xa69   :  { %3380 = vmatpush3.msra.mxu1 %v3029_v14  ;;  %3387 = vmatprep.mubr.msk.f32.mxu1 %vm27_vm0, %v3618_v36 }
 0xa6a   :  { %3381 = vmatprep.subr.mxu1 %v3028_v15 }
 0xa6b   :  { %3382 = vmatpush3.msra.mxu1 %v3028_v15 }
 0xa6c   :  { %3383 = vmatprep.subr.mxu1 %v3027_v16 }
 0xa6d   :  { %3384 = vmatpush3.msra.mxu1 %v3027_v16 }
 0xa6e   :  { %3385 = vmatprep.subr.mxu1 %v3026_v17 }
 0xa6f   :  { %3386 = vmatpush3.msra.mxu1 %v3026_v17 }
 0xa70   :  { %3388 = vmatmul.mubr.msk.f32.vlgmr.msra.gmra.mxu1 %vm27_vm0, %v3622_v39  ;;  %3400 = vmatprep.subr.mxu1 %v3533_v47 }
 0xa71   :  { %3402 = vmatprep.mubr.msk.f32.mxu1 %vm3534_vm1, %v3533_v47 }
 0xb1c   :  { %v1859_v20 = vpop.f32.mrf.mxu0 }
 0xb1d   :  { %3354 = vmatprep.mubr.msk.f32.mxu0 %vm318_vm2, %v1859_v20 }
 0xb1e   :  { %v3346_v21 = vpop.f32.mrf.mxu0 }
 0xb20   :  { %v1932_v22 = vpop.f32.mrf.mxu1 }
 0xb21   :  { %3355 = vmatmul.mubr.msk.f32.vlgmr.msra.gmra.mxu0 %vm318_vm2, %v1932_v22 }
 0xb22   :  { %3369 = vmatpush3.msra.mxu0 %v3023_v19  ;;  %v3351_v24 = vpop.f32.mrf.mxu1  ;;  %3376 = vmatprep.mubr.msk.f32.mxu0 %vm27_vm0, %v3618_v36 }
 0xb23   :  { %3370 = vmatprep.subr.mxu0 %v3022_v23 }
 0xb24   :  { %3371 = vmatpush3.msra.mxu0 %v3022_v23 }
 0xb25   :  { %3372 = vmatprep.subr.mxu0 %v3021_v25 }
 0xb26   :  { %3373 = vmatpush3.msra.mxu0 %v3021_v25 }
 0xb27   :  { %3374 = vmatprep.subr.mxu0 %v3020_v29 }
 0xb28   :  { %3375 = vmatpush3.msra.mxu0 %v3020_v29  ;;  %v3367_v36 = vpop.f32.mrf.mxu1 }
 0xb29   :  { %3377 = vmatmul.mubr.msk.f32.vlgmr.msra.gmra.mxu0 %vm27_vm0, %v3622_v39  ;;  %3390 = vmatprep.subr.mxu0 %v3533_v47 }
 0xb2a   :  { %3392 = vmatprep.mubr.msk.f32.mxu0 %vm3534_vm1, %v3533_v47  ;;  %v2092_v30 = vpop.f32.mrf.mxu1 }
 0xb30   :  { %v3389_v32 = vpop.f32.mrf.mxu1 }
 0xb32   :  { %v2252_v33 = vpop.f32.mrf.mxu1 }
 0xb33   :  { %3401 = vmatpush3.msra.mxu1 %v2252_v33  ;;  %v2719_v33 = vld [vmem:[%s4035_s3 + $0x18] sm:$0xff] }
 0xb34   :  { %3410 = vmatprep.subr.mxu1 %v3038_v5 }
 0xbe1   :  { %v3356_v35 = vpop.f32.mrf.mxu0 }
 0xbe2   :  { %v2020_v41 = vadd.f32 %v3356_v35, %v1369_v34  ;;  %v2718_v34 = vld [vmem:[%s4035_s3 + $0x10] sm:$0xff]  ;;  %v2717_v35 = vld [vmem:[%s4035_s3 + $0x8] sm:$0xff] }
 0xbe3   :  { %v2010_v42 = vpop.f32.mrf.mxu0 }
 0xbe4   :  { %v3912_v39 = vadd.f32 %v2010_v42, %v1364_v40  ;;  %v2716_v40 = vld [vmem:[%s4035_s3] sm:$0xff] }
 0xbe9   :  { %v3378_v43 = vpop.f32.mrf.mxu0 }
 0xbeb   :  { %v2172_v44 = vpop.f32.mrf.mxu0 }
 0xbec   :  { %3391 = vmatpush3.xpose.msk.msra.mxu0 %vm318_vm2, %v2172_v44 }
 0xbed   :  { %3395 = vmatprep.subr.mxu0 %v3533_v47 }
 0xbef   :  { %3393 = vmatmul.mubr.msk.f32.vlgmr.msra.gmra.mxu0 %vm318_vm2, %v2092_v30 }
 0xbf0   :  { %3396 = vmatpush3.xpose.msk.msra.mxu0 %vm318_vm2, %v3378_v43  ;;  %3397 = vmatprep.mubr.msk.f32.mxu0 %vm3534_vm1, %v3533_v47 }
 0xbf1   :  { %3405 = vmatprep.subr.mxu0 %v3533_v47 }
 0xbf3   :  { %3398 = vmatmul.mubr.msk.f32.vlgmr.msra.gmra.mxu0 %vm318_vm2, %v3367_v36 }
 0xbf4   :  { %3406 = vmatpush3.msra.mxu0 %v3389_v32  ;;  %3407 = vmatprep.mubr.msk.f32.mxu0 %vm3534_vm1, %v3533_v47 }
 0xbf5   :  { %3415 = vmatprep.subr.mxu0 %v2719_v33 }
 0xcaf   :  { %v2333_v27 = vpop.f32.mrf.mxu0 }
 0xcb0   :  { %v2413_v31 = vmul.f32 0.35355338, %v2333_v27 }
 0xcb1   :  { %v3394_v37 = vpop.f32.mrf.mxu0 }
 0xcb2   :  { %v2415_v38 = vadd.f32 %v2413_v31, %v3674_v56  ;;  %v2706_v31 = vsub.s32 3, %v3607_v26 }
 0xcb3   :  { %v2409_v45 = vpop.f32.mrf.mxu0 }
 0xcb4   :  { %v2414_v46 = vmul.f32 0.35355338, %v2409_v45  ;;  %v2417_v48 = vsel %vm318_vm2, %v2415_v38, -inf  ;;  %v2712_v45 = vsub.s32 4, %v3607_v26 }
 0xcb5   :  { %2418 = vmax.xlane.f32.xlu0 %v2417_v48  ;;  %v3399_v49 = vpop.f32.mrf.mxu0 }
 0xcb6   :  { %v2416_v50 = vadd.f32 %v2414_v46, %v3674_v56 }
 0xcb8   :  { %v2420_v51 = vsel %vm318_vm2, %v2416_v50, -inf }
 0xcb9   :  { %2421 = vmax.xlane.f32.xlu1 %v2420_v51  ;;  %v2713_v51 = vrot.slane %v3613_v28, %v2712_v45 }
 0xd3e   :  { %v2419_v52 = vpop.xlane.xlu0 %2418 }
 0xd3f   :  { %v2423_v53 = vsub.f32 %v2415_v38, %v2419_v52  ;;  %v2707_v38 = vrot.slane %v3613_v28, %v2706_v31  ;;  %v2836_v28 = vld [vmem:[%s4036_s4 + $0x68] sm:$0xff] }
 0xd41   :  { %v2425_v54 = vmul.f32 1.442695, %v2423_v53 }
 0xd42   :  { %v2422_v47 = vpop.xlane.xlu1 %2421 }
 0xd43   :  { %3494 = vpow2.f32 %v2425_v54  ;;  %v2424_v55 = vsub.f32 %v2416_v50, %v2422_v47  ;;  %v2838_v47 = vld [vmem:[%s4036_s4 + $0x78] sm:$0xff] }
 0xd45   :  { %v2427_v57 = vmul.f32 1.442695, %v2424_v55  ;;  %v2837_v55 = vld [vmem:[%s4036_s4 + $0x70] sm:$0xff] }
 0xd47   :  { %3496 = vpow2.f32 %v2427_v57  ;;  %v2835_v57 = vld [vmem:[%s4036_s4 + $0x60] sm:$0xff] }
 0xd50   :  { %v3495_v58 = vpop.eup %3494 }
 0xd51   :  { %v2429_v59 = vsel %vm318_vm2, %v3495_v58, 0.0 }
 0xd52   :  { %2430 = vadd.xlane.f32.xlu0 %v2429_v59  ;;  %v2833_v59 = vld [vmem:[%s4036_s4 + $0x50] sm:$0xff] }
 0xd54   :  { %v3497_v60 = vpop.eup %3496 }
 0xd55   :  { %v2432_v61 = vsel %vm318_vm2, %v3497_v60, 0.0 }
 0xd56   :  { %2433 = vadd.xlane.f32.xlu1 %v2432_v61  ;;  %v2831_v61 = vld [vmem:[%s4036_s4 + $0x40] sm:$0xff] }
 0xddb   :  { %v2431_v56 = vpop.xlane.xlu0 %2430 }
 0xddc   :  { %3498 = vrcp.f32 %v2431_v56  ;;  %v2830_v56 = vld [vmem:[%s4036_s4 + $0x38] sm:$0xff] }
 0xddf   :  { %v2434_v62 = vpop.xlane.xlu1 %2433 }
 0xde0   :  { %3500 = vrcp.f32 %v2434_v62  ;;  %v2829_v62 = vld [vmem:[%s4036_s4 + $0x30] sm:$0xff] }
 0xde9   :  { %v3499_v63 = vpop.eup %3498 }
 0xdea   :  { %v2437_v2 = vmul.f32 %v3499_v63, %v3495_v58  ;;  %v2834_v58 = vld [vmem:[%s4036_s4 + $0x58] sm:$0xff]  ;;  %v2828_v63 = vld [vmem:[%s4036_s4 + $0x28] sm:$0xff] }
 0xdec   :  { %3403 = vmatmul.mubr.msk.f32.vlgmr.msra.gmra.mxu1 %vm318_vm2, %v2437_v2  ;;  %v2827_v2 = vld [vmem:[%s4036_s4 + $0x20] sm:$0xff] }
 0xded   :  { %v3501_v3 = vpop.eup %3500  ;;  %3411 = vmatpush3.msra.mxu1 %v3038_v5  ;;  %v2824_v5 = vld [vmem:[%s4036_s4 + $0x8] sm:$0xff] }
 0xdee   :  { %v2438_v4 = vmul.f32 %v3501_v3, %v3497_v60  ;;  %3426 = vmatprep.subr.mxu1 %v2838_v47  ;;  %v2832_v60 = vld [vmem:[%s4036_s4 + $0x48] sm:$0xff]  ;;  %v2826_v3 = vld [vmem:[%s4036_s4 + $0x18] sm:$0xff] }
 0xdf0   :  { %3408 = vmatmul.mubr.msk.f32.vlgmr.msra.gmra.mxu0 %vm318_vm2, %v2438_v4  ;;  %v2825_v4 = vld [vmem:[%s4036_s4 + $0x10] sm:$0xff] }
 0xdf1   :  { %3416 = vmatpush3.msra.mxu0 %v2719_v33 }
 0xdf2   :  { %3417 = vmatprep.subr.mxu0 %v2718_v34 }
 0xdf3   :  { %3418 = vmatpush3.msra.mxu0 %v2718_v34 }
 0xdf4   :  { %3419 = vmatprep.subr.mxu0 %v2717_v35 }
 0xdf5   :  { %3420 = vmatpush3.msra.mxu0 %v2717_v35  ;;  %v2841_v35 = vsub.s32 6, %v3607_v26 }
 0xdf6   :  { %3421 = vmatprep.subr.mxu0 %v2716_v40 }
 0xdf7   :  { %3422 = vmatpush3.msra.mxu0 %v2716_v40 }
 0xeac   :  { %v2508_v6 = vpop.f32.mrf.mxu1 }
 0xead   :  { %3412 = vmatprep.mubr.msk.f32.mxu1 %vm318_vm2, %v2508_v6  ;;  %v2823_v6 = vld [vmem:[%s4036_s4] sm:$0xff]  ;;  %s3535_s4 = smov [#allocation2]  }
 0xeae   :  { %v3404_v7 = vpop.f32.mrf.mxu1 }
 0xeaf   :  { %v2722_v7 = vsub.s32 5, %v3607_v26 }
 0xeb0   :  { %v2581_v8 = vpop.f32.mrf.mxu0 }
 0xeb1   :  { %3413 = vmatmul.mubr.msk.f32.vlgmr.msra.gmra.mxu1 %vm318_vm2, %v2581_v8  ;;  %v3510_v8 = vld [vmem:[%s4037_s5] sm:$0xff]  ;;  %s2927_s5 = sshll.u32 %s3535_s4, 4  ;;  %s2928_s5 = int_to_ptr.vmem [resolvable:$true] %s2927_s5 }
 0xeb2   :  { %v3409_v9 = vpop.f32.mrf.mxu0  ;;  %3427 = vmatpush3.msra.mxu1 %v2838_v47  ;;  %v2842_v40 = vrot.slane %v3510_v8, %v2841_v35  ;;  %s3511_s17 = scalar_lea.vmem %s2928_s5, 256  ;;  %p3516_p1 = scmp.lt.s32.totalorder %s2928_s5, %s2928_s5 }
 0xeb3   :  { %3428 = vmatprep.subr.mxu1 %v2837_v55  ;;  %v2723_v9 = vrot.slane %v3510_v8, %v2722_v7  ;;  %p3512_p0 = scmp.ne.s32.totalorder %s2928_s5, %s3511_s17  ;;  %p3517_p2 = scmp.lt.s32.totalorder %s3511_s17, %s3511_s17 }
 0xeb4   :  { %3429 = vmatpush3.msra.mxu1 %v2837_v55 }
 0xeb5   :  { %3430 = vmatprep.subr.mxu1 %v2836_v28  ;;  %p3518_p3 = por %p3517_p2, %p3516_p1 }
 0xeb6   :  { %3431 = vmatpush3.msra.mxu1 %v2836_v28 }
 0xeb7   :  { %3432 = vmatprep.subr.mxu1 %v2835_v57  ;;  %p3519_p4 = pnand %p3518_p3, %p3512_p0 }
 0xeb8   :  { %3433 = vmatpush3.msra.mxu1 %v2835_v57 }
 0xeb9   :  { %3434 = vmatprep.subr.mxu1 %v2834_v58 }
 0xeba   :  { %3435 = vmatpush3.msra.mxu1 %v2834_v58 }
 0xebb   :  { %3436 = vmatprep.subr.mxu1 %v2833_v59 }
 0xebc   :  { %3437 = vmatpush3.msra.mxu1 %v2833_v59 }
 0xebd   :  { %3438 = vmatprep.subr.mxu1 %v2832_v60 }
 0xebe   :  { %3439 = vmatpush3.msra.mxu1 %v2832_v60 }
 0xebf   :  { %3440 = vmatprep.subr.mxu1 %v2831_v61 }
 0xec0   :  { %3441 = vmatpush3.msra.mxu1 %v2831_v61 }
 0xec1   :  { %3442 = vmatprep.subr.mxu1 %v2830_v56 }
 0xec2   :  { %3443 = vmatpush3.msra.mxu1 %v2830_v56 }
 0xec3   :  { %3444 = vmatprep.subr.mxu1 %v2829_v62 }
 0xec4   :  { %3445 = vmatpush3.msra.mxu1 %v2829_v62 }
 0xec5   :  { %3446 = vmatprep.subr.mxu1 %v2828_v63 }
 0xec6   :  { %3447 = vmatpush3.msra.mxu1 %v2828_v63 }
 0xec7   :  { %3448 = vmatprep.subr.mxu1 %v2827_v2 }
 0xec8   :  { %3449 = vmatpush3.msra.mxu1 %v2827_v2 }
 0xec9   :  { %3450 = vmatprep.subr.mxu1 %v2826_v3 }
 0xeca   :  { %3451 = vmatpush3.msra.mxu1 %v2826_v3 }
 0xecb   :  { %3452 = vmatprep.subr.mxu1 %v2825_v4 }
 0xecc   :  { %3453 = vmatpush3.msra.mxu1 %v2825_v4 }
 0xecd   :  { %3454 = vmatprep.subr.mxu1 %v2824_v5 }
 0xece   :  { %3455 = vmatpush3.msra.mxu1 %v2824_v5 }
 0xecf   :  { %3456 = vmatprep.subr.mxu1 %v2823_v6 }
 0xed0   :  { %3457 = vmatpush3.msra.mxu1 %v2823_v6 }
 0xf71   :  { %v3414_v12 = vpop.f32.mrf.mxu1 }
 0xf72   :  { %v2669_v13 = vadd.f32 %v3414_v12, %v2020_v41 }
 0xf73   :  { %v2659_v14 = vpop.f32.mrf.mxu1 }
 0xf74   :  { %v2675_v15 = vadd.f32 %v2673_v11, %v2669_v13  ;;  %v2668_v16 = vadd.f32 %v2659_v14, %v3912_v39 }
 0xf76   :  { %v3941_v17 = vadd.f32 %v2675_v15, %v3581_v1  ;;  %v2674_v18 = vadd.f32 %v2673_v11, %v2668_v16 }
 0xf78   :  { %v3944_v19 = vadd.f32 %v2674_v18, %v3576_v0  ;;  %v2681_v20 = vsel %vm27_vm0, %v3941_v17, 0.0 }
 0xf79   :  { %2682 = vadd.xlane.f32.xlu1 %v2681_v20 }
 0xf7a   :  { %v2678_v21 = vsel %vm27_vm0, %v3944_v19, 0.0 }
 0xf7b   :  { %2679 = vadd.xlane.f32.xlu0 %v2678_v21 }
0x1002   :  { %v2683_v22 = vpop.xlane.xlu1 %2682 }
0x1003   :  { %v2685_v23 = vmul.f32 0.03125, %v2683_v22 }
0x1004   :  { %v2680_v24 = vpop.xlane.xlu0 %2679 }
0x1005   :  { %v2687_v25 = vsub.f32 %v3941_v17, %v2685_v23  ;;  %v2684_v29 = vmul.f32 0.03125, %v2680_v24 }
0x1007   :  { %v2686_v1 = vsub.f32 %v3944_v19, %v2684_v29  ;;  %v2689_v36 = vmul.f32 %v2687_v25, %v2687_v25 }
0x1009   :  { %v2693_v0 = vsel %vm27_vm0, %v2689_v36, 0.0  ;;  %v2688_v30 = vmul.f32 %v2686_v1, %v2686_v1 }
0x100a   :  { %2694 = vadd.xlane.f32.xlu1 %v2693_v0 }
0x100b   :  { %v2690_v32 = vsel %vm27_vm0, %v2688_v30, 0.0 }
0x100c   :  { %2691 = vadd.xlane.f32.xlu0 %v2690_v32 }
0x1093   :  { %v2695_v41 = vpop.xlane.xlu1 %2694 }
0x1094   :  { %v2697_v42 = vmul.f32 0.03125, %v2695_v41 }
0x1095   :  { %v2692_v39 = vpop.xlane.xlu0 %2691 }
0x1096   :  { %v2699_v43 = vadd.f32 1e-05, %v2697_v42  ;;  %v2696_v44 = vmul.f32 0.03125, %v2692_v39 }
0x1098   :  { %3502 = vrsqrt.f32 %v2699_v43  ;;  %v2698_v27 = vadd.f32 1e-05, %v2696_v44 }
0x109a   :  { %3504 = vrsqrt.f32 %v2698_v27 }
0x10a5   :  { %v3503_v37 = vpop.eup %3502 }
0x10a6   :  { %v2703_v46 = vmul.f32 %v3503_v37, %v2687_v25 }
0x10a7   :  { %v3505_v48 = vpop.eup %3504 }
0x10a8   :  { %v2702_v49 = vmul.f32 %v3505_v48, %v2686_v1  ;;  %v2709_v50 = vmul.f32 %v2707_v38, %v2703_v46 }
0x10aa   :  { %v2708_v52 = vmul.f32 %v2707_v38, %v2702_v49  ;;  %v2715_v54 = vadd.f32 %v2713_v51, %v2709_v50 }
0x10ac   :  { %v2714_v53 = vadd.f32 %v2713_v51, %v2708_v52 }
0x10ae   :  { %3423 = vmatprep.mubr.msk.f32.mxu0 %vm27_vm0, %v2714_v53 }
0x10af   :  { %3424 = vmatmul.mubr.msk.f32.vlgmr.msra.gmra.mxu0 %vm27_vm0, %v2715_v54 }
0x116f   :  { %v3425_v10 = vpop.f32.mrf.mxu0 }
0x1170   :  { %v2802_v11 = vadd.f32 %v3425_v10, %v2723_v9 }
0x1171   :  { %v2796_v12 = vpop.f32.mrf.mxu0 }
0x1172   :  { %v2806_v13 = vmul.f32 %v2802_v11, %v2802_v11  ;;  %v2797_v14 = vadd.f32 %v2796_v12, %v2723_v9  ;;  %v2810_v32 = vmul.f32 0.5, %v2802_v11 }
0x1174   :  { %v2808_v15 = vmul.f32 %v2806_v13, %v2802_v11  ;;  %v2805_v16 = vmul.f32 %v2797_v14, %v2797_v14  ;;  %v2809_v0 = vmul.f32 0.5, %v2797_v14 }
0x1176   :  { %v2812_v18 = vmul.f32 0.044715, %v2808_v15  ;;  %v2807_v20 = vmul.f32 %v2805_v16, %v2797_v14 }
0x1178   :  { %v2814_v21 = vadd.f32 %v2812_v18, %v2802_v11  ;;  %v2811_v22 = vmul.f32 0.044715, %v2807_v20 }
0x117a   :  { %v2816_v23 = vmul.f32 0.7978846, %v2814_v21  ;;  %v2813_v24 = vadd.f32 %v2811_v22, %v2797_v14 }
0x117c   :  { %3506 = vtanh.f32 %v2816_v23  ;;  %v2815_v25 = vmul.f32 0.7978846, %v2813_v24 }
0x117e   :  { %3508 = vtanh.f32 %v2815_v25 }
0x1189   :  { %v3507_v29 = vpop.eup %3506 }
0x118a   :  { %v2820_v36 = vadd.f32 1.0, %v3507_v29 }
0x118b   :  { %v3509_v1 = vpop.eup %3508 }
0x118c   :  { %v2819_v30 = vadd.f32 1.0, %v3509_v1  ;;  %v2822_v34 = vmul.f32 %v2820_v36, %v2810_v32 }
0x118e   :  { %v2821_v33 = vmul.f32 %v2819_v30, %v2809_v0 }
0x1190   :  { %3458 = vmatprep.mubr.f32.mxu1 %v2821_v33 }
0x1191   :  { %3459 = vmatmul.mubr.f32.vlgmr.msra.gmra.mxu1 %v2822_v34 }
0x1251   :  { %v3460_v41 = vpop.f32.mrf.mxu1 }
0x1252   :  { %v2915_v42 = vadd.f32 %v3460_v41, %v2842_v40 }
0x1253   :  { %v2909_v39 = vpop.f32.mrf.mxu1 }
0x1254   :  { %v2919_v43 = vadd.f32 %v2915_v42, %v3941_v17  ;;  %v2910_v44 = vadd.f32 %v2909_v39, %v2842_v40 }
0x1256   :  { %2921 = vst.msk [vmem:[#allocation2 + $0x8] sm:$0xff] %vm27_vm0, %v2919_v43  ;;  %v2918_v27 = vadd.f32 %v2910_v44, %v3944_v19 }
0x1258   :  { %2920 = vst.msk [vmem:[#allocation2] sm:$0xff] %vm27_vm0, %v2918_v27 }
0x1259   :  { %3522 = shalt.err (!%p3519_p4)
}
0x125a   :  { %s3536_s18 = smov 128   ;;  %s3537_s19 = smov 8  }
0x125b   :  { %2933 = dma.vmem_to_hbm [thread:$0]  %s2928_s5, 256, %s4038_s6, [#allocation3], %s3536_s18, %s3536_s18, %s3537_s19  }
0x125c   :  { %3531 = dma.done.wait [#allocation3], 256  }
0x125d   :  { %3532 = vsyncadd [#allocation3], 4294967040 }
0x125e   :  { %2937 = vsyncpa [#allocation3], 1 }

</bundles_post_ra>
